<compile_context>
chip_gen: v7x
topology: tpu7x:2x2x1
jax: 0.10.0
libtpu: 0.0.40
codegen_flags: <defaults>
</compile_context>

<pallas_src>
import jax
import jax.numpy as jnp
from jax.experimental import pallas as pl
from jax.experimental.pallas import tpu as pltpu

HIDDEN = 768        # codeBERT hidden_size
D1 = 256            # classifier out
D2 = 128            # fc_layer1 out
NUM_CLASSES = 2     # fc_layer2 out
OUT_PAD = 128       # lane-dense padded logits width
BIAS_PACK = HIDDEN + D1 + D2 + OUT_PAD   # 1280 = 10 * 128 (lane-dense)
VOCAB = 100
SEQ = 8
BATCH = 2
B_PAD = 8           # pad batch to one full f32 sublane group


def fused_head_kernel(tok_ref, mask_ref, wpa_ref, wpb_ref, bias_ref, out_ref):
    """Fused: masked-mean pool -> tanh(dense 768->768) -> Linear(768->256)
    -> Linear(256->128) -> Dropout(eval, identity) -> Linear(128->OUT_PAD)."""
    # ---- masked mean pooling (fused; padded batch rows have mask == 0) ----
    tok = tok_ref[...]                                   # (B_PAD, S, H) f32
    mask = mask_ref[...]                                 # (B_PAD, S, 1) f32
    summed = jnp.sum(tok * mask, axis=1)                 # (B_PAD, H)
    denom = jnp.maximum(jnp.sum(mask, axis=1), 1.0)      # (B_PAD, 1)
    mean = summed / denom                                # (B_PAD, H) f32

    # ---- unpack the single lane-dense bias row (one DMA for all biases) ----
    bp = bias_ref[:, 0:HIDDEN]                                    # (1, 768)
    b1 = bias_ref[:, HIDDEN:HIDDEN + D1]                          # (1, 256)
    b2 = bias_ref[:, HIDDEN + D1:HIDDEN + D1 + D2]                # (1, 128)
    b3 = bias_ref[:, HIDDEN + D1 + D2:BIAS_PACK]                  # (1, 128)

    # ---- unpack bf16-STORED weights; upcast to f32 (weight-only quant) ----
    wp = wpa_ref[:, :HIDDEN].astype(jnp.float32)                  # (768, 768)
    w1 = wpa_ref[:, HIDDEN:].astype(jnp.float32)                  # (768, 256)
    w2 = wpb_ref[:, :D2].astype(jnp.float32)                      # (256, 128)
    w3 = wpb_ref[:D2, D2:].astype(jnp.float32)                    # (128, 128)

    # pooler = tanh(dense(mean))  -- stand-in for the backbone pooler head.
    pooler = jnp.tanh(
        jnp.dot(mean, wp, preferred_element_type=jnp.float32) + bp)

    # output1 = self.classifier(pooler)
    h1 = jnp.dot(pooler, w1, preferred_element_type=jnp.float32) + b1

    # output2 = self.fc_layer1(output1)
    h2 = jnp.dot(h1, w2, preferred_element_type=jnp.float32) + b2

    # self.dropout(output2): p=0.5 dropout is identity in eval/inference mode.
    # TODO(synk): training-mode dropout would use pltpu.prng_seed/prng_random_bits.

    # output3 = self.fc_layer2(...)   (zero-padded to 128 output lanes)
    out_ref[...] = jnp.dot(h2, w3, preferred_element_type=jnp.float32) + b3


def _cost_estimate():
    mm_flops = 2 * B_PAD * (HIDDEN * HIDDEN + HIDDEN * D1 + D1 * D2 + D2 * OUT_PAD)
    pool_flops = 3 * B_PAD * SEQ * HIDDEN            # mul + add + divide
    transcendentals = B_PAD * HIDDEN                 # tanh
    bytes_accessed = (
        4 * B_PAD * SEQ * (HIDDEN + 1)               # tok f32 + mask f32
        + 2 * (HIDDEN * (HIDDEN + D1) + D1 * 2 * D2)  # packed bf16 weights
        + 4 * BIAS_PACK                              # packed f32 biases
        + 4 * B_PAD * OUT_PAD)                       # f32 output
    return pl.CostEstimate(flops=mm_flops + pool_flops,
                           transcendentals=transcendentals,
                           bytes_accessed=bytes_accessed)


def fused_forward(tok_pad, mask3, wpa, wpb, bias_pack):
    """Single pallas_call, single grid point: all operands (~1.9 MB) fit VMEM as
    full blocks on every generation (well under v7x's 64 MiB)."""
    vmem = pl.BlockSpec(memory_space=pltpu.VMEM)
    return pl.pallas_call(
        fused_head_kernel,
        out_shape=jax.ShapeDtypeStruct((B_PAD, OUT_PAD), jnp.float32),
        in_specs=[vmem] * 5,
        out_specs=vmem,
        cost_estimate=_cost_estimate(),
    )(tok_pad, mask3, wpa, wpb, bias_pack)


def standin_backbone_mean(input_ids, attn_masks, emb):
    """Host/reference-side stand-in for the CodeBERT backbone up to the pooler
    dense: embedding lookup -> masked mean.  Mirrors the in-kernel math."""
    # TODO(synk): the real CodeBERT transformer backbone is external to this module.
    tok = emb[input_ids]                              # (B, S, H)
    mask = attn_masks.astype(jnp.float32)[..., None]  # (B, S, 1)
    summed = jnp.sum(tok * mask, axis=1)
    denom = jnp.maximum(jnp.sum(mask, axis=1), 1.0)
    return summed / denom                             # (B, H)


def init_params(key):
    ks = jax.random.split(key, 8)
    emb = jax.random.normal(ks[0], (VOCAB, HIDDEN), jnp.float32) * 0.02
    wp = jax.random.normal(ks[1], (HIDDEN, HIDDEN), jnp.float32) * 0.02
    bp = jnp.zeros((1, HIDDEN), jnp.float32)
    w1 = jax.random.normal(ks[2], (HIDDEN, D1), jnp.float32) * 0.02
    b1 = jax.random.normal(ks[3], (1, D1), jnp.float32) * 0.01
    w2 = jax.random.normal(ks[4], (D1, D2), jnp.float32) * 0.02
    b2 = jax.random.normal(ks[5], (1, D2), jnp.float32) * 0.01
    w3 = jax.random.normal(ks[6], (D2, NUM_CLASSES), jnp.float32) * 0.02
    b3 = jax.random.normal(ks[7], (1, NUM_CLASSES), jnp.float32) * 0.01
    return emb, wp, bp, w1, b1, w2, b2, w3, b3


def prepare_kernel_weights(params):
    """One-time, off-hot-path weight packing:
       * wpa  (768, 1024) bf16 = [ Wp | W1 ]
       * wpb  (256,  256) bf16 = [ W2 | zero-padded W3 ]  (W3 in rows :128, cols 128:130)
       * bias_pack (1, 1280) f32 = [ bp | b1 | b2 | zero-padded b3 ]
    bf16 is storage/DMA-only; the kernel upcasts to f32 before the matmuls."""
    _, wp, bp, w1, b1, w2, b2, w3, b3 = params
    wpa = jnp.concatenate([wp, w1], axis=1).astype(jnp.bfloat16)          # (768, 1024)
    w3_pad = jnp.zeros((D1, OUT_PAD), jnp.float32).at[:D2, :NUM_CLASSES].set(w3)
    wpb = jnp.concatenate([w2, w3_pad], axis=1).astype(jnp.bfloat16)      # (256, 256)
    b3_pad = jnp.zeros((1, OUT_PAD), jnp.float32).at[:, :NUM_CLASSES].set(b3)
    bias_pack = jnp.concatenate([bp, b1, b2, b3_pad], axis=1)             # (1, 1280) f32
    return wpa, wpb, bias_pack


@jax.jit
def code_bert_classifier_forward(input_ids, attn_masks, emb, wpa, wpb, bias_pack):
    B, S = input_ids.shape
    # Pad the tiny integer inputs to B_PAD rows (padded rows get mask == 0, so
    # the in-kernel masked mean yields zeros for them; they are sliced away).
    ids_pad = jnp.zeros((B_PAD, S), jnp.int32).at[:B].set(input_ids)
    mask_pad = jnp.zeros((B_PAD, S), jnp.float32).at[:B].set(
        attn_masks.astype(jnp.float32))
    # Embedding gather stays in plain-JAX glue (backbone stand-in input).
    tok_pad = emb[ids_pad]                               # (B_PAD, S, H) f32
    out_pad = fused_forward(tok_pad, mask_pad[:, :, None], wpa, wpb, bias_pack)
    return out_pad[:B, :NUM_CLASSES]                     # (B, 2) logits


if __name__ == "__main__":
    key = jax.random.PRNGKey(0)
    pkey, ikey = jax.random.split(key)
    params = init_params(pkey)
    emb = params[0]
    wpa, wpb, bias_pack = prepare_kernel_weights(params)

    input_ids = jax.random.randint(ikey, (BATCH, SEQ), 0, VOCAB, dtype=jnp.int32)
    attn_masks = jnp.ones((BATCH, SEQ), dtype=jnp.int32)

    logits = code_bert_classifier_forward(input_ids, attn_masks, emb,
                                          wpa, wpb, bias_pack)
    logits = jax.block_until_ready(logits)
    assert logits.shape == (BATCH, NUM_CLASSES)

    # --- sanity checks ---------------------------------------------------
    mean = standin_backbone_mean(input_ids, attn_masks, emb)
    _, wp, bp, w1, b1, w2, b2, w3, b3 = params
    hi = jax.lax.Precision.HIGHEST

    # (1) mirror of the kernel math: bf16-quantized weights upcast to f32,
    #     f32 activations / accumulation everywhere.
    def q(w):
        return w.astype(jnp.bfloat16).astype(jnp.float32)
    pooler_r = jnp.tanh(jnp.dot(mean, q(wp), precision=hi) + bp)
    h1_r = jnp.dot(pooler_r, q(w1), precision=hi) + b1
    h2_r = jnp.dot(h1_r, q(w2), precision=hi) + b2
    ref_mirror = jnp.dot(h2_r, q(w3), precision=hi) + b3
    assert jnp.allclose(logits, ref_mirror, atol=1e-3, rtol=1e-3), (
        logits, ref_mirror)

    # (2) full-f32 PyTorch-semantics reference (only weight storage differs).
    pooler_f = jnp.tanh(jnp.dot(mean, wp, precision=hi) + bp)
    ref_f32 = (jnp.dot(jnp.dot(jnp.dot(pooler_f, w1, precision=hi) + b1,
                               w2, precision=hi) + b2,
                       w3, precision=hi) + b3)
    assert jnp.allclose(logits, ref_f32, atol=2e-3, rtol=2e-2), (logits, ref_f32)

    print("KERNEL_OK")
</pallas_src>

<mosaic_0001>
module attributes {stable_mosaic.version = 11 : i64} {
  func.func @fused_head_kernel(%arg0: memref<8x8x768xf32, #tpu.memory_space<vmem>>, %arg1: memref<8x8x1xf32, #tpu.memory_space<vmem>>, %arg2: memref<768x1024xbf16, #tpu.memory_space<vmem>>, %arg3: memref<256x256xbf16, #tpu.memory_space<vmem>>, %arg4: memref<1x1280xf32, #tpu.memory_space<vmem>>, %arg5: memref<8x128xf32, #tpu.memory_space<vmem>>) attributes {dimension_semantics = [], scalar_prefetch = 0 : i64, scratch_operands = 0 : i64, tpu.core_type = #tpu.core_type<tc>} {
    %c0 = arith.constant 0 : index
    %c0_0 = arith.constant 0 : index
    %c0_1 = arith.constant 0 : index
    %0 = vector.load %arg0[%c0, %c0_0, %c0_1] : memref<8x8x768xf32, #tpu.memory_space<vmem>>, vector<8x8x768xf32>
    %c0_2 = arith.constant 0 : index
    %c0_3 = arith.constant 0 : index
    %c0_4 = arith.constant 0 : index
    %1 = vector.load %arg1[%c0_2, %c0_3, %c0_4] : memref<8x8x1xf32, #tpu.memory_space<vmem>>, vector<8x8x1xf32>
    %2 = vector.broadcast %1 : vector<8x8x1xf32> to vector<8x8x768xf32>
    %3 = arith.mulf %0, %2 : vector<8x8x768xf32>
    %cst = arith.constant dense<0.000000e+00> : vector<8x768xf32>
    %4 = vector.multi_reduction <add>, %3, %cst [1] : vector<8x8x768xf32> to vector<8x768xf32>
    %cst_5 = arith.constant dense<0.000000e+00> : vector<8x1xf32>
    %5 = vector.multi_reduction <add>, %1, %cst_5 [1] : vector<8x8x1xf32> to vector<8x1xf32>
    %cst_6 = arith.constant 1.000000e+00 : f32
    %6 = vector.broadcast %cst_6 : f32 to vector<8x1xf32>
    %7 = arith.maximumf %5, %6 : vector<8x1xf32>
    %8 = vector.broadcast %7 : vector<8x1xf32> to vector<8x768xf32>
    %9 = arith.divf %4, %8 : vector<8x768xf32>
    %c0_7 = arith.constant 0 : index
    %c0_8 = arith.constant 0 : index
    %10 = vector.load %arg4[%c0_7, %c0_8] : memref<1x1280xf32, #tpu.memory_space<vmem>>, vector<1x768xf32>
    %c0_9 = arith.constant 0 : index
    %c768 = arith.constant 768 : index
    %11 = vector.load %arg4[%c0_9, %c768] : memref<1x1280xf32, #tpu.memory_space<vmem>>, vector<1x256xf32>
    %c0_10 = arith.constant 0 : index
    %c1024 = arith.constant 1024 : index
    %12 = vector.load %arg4[%c0_10, %c1024] : memref<1x1280xf32, #tpu.memory_space<vmem>>, vector<1x128xf32>
    %c0_11 = arith.constant 0 : index
    %c1152 = arith.constant 1152 : index
    %13 = vector.load %arg4[%c0_11, %c1152] : memref<1x1280xf32, #tpu.memory_space<vmem>>, vector<1x128xf32>
    %c0_12 = arith.constant 0 : index
    %c0_13 = arith.constant 0 : index
    %14 = vector.load %arg2[%c0_12, %c0_13] : memref<768x1024xbf16, #tpu.memory_space<vmem>>, vector<768x768xbf16>
    %15 = arith.extf %14 : vector<768x768xbf16> to vector<768x768xf32>
    %c0_14 = arith.constant 0 : index
    %c768_15 = arith.constant 768 : index
    %16 = vector.load %arg2[%c0_14, %c768_15] : memref<768x1024xbf16, #tpu.memory_space<vmem>>, vector<768x256xbf16>
    %17 = arith.extf %16 : vector<768x256xbf16> to vector<768x256xf32>
    %c0_16 = arith.constant 0 : index
    %c0_17 = arith.constant 0 : index
    %18 = vector.load %arg3[%c0_16, %c0_17] : memref<256x256xbf16, #tpu.memory_space<vmem>>, vector<256x128xbf16>
    %19 = arith.extf %18 : vector<256x128xbf16> to vector<256x128xf32>
    %c0_18 = arith.constant 0 : index
    %c128 = arith.constant 128 : index
    %20 = vector.load %arg3[%c0_18, %c128] : memref<256x256xbf16, #tpu.memory_space<vmem>>, vector<128x128xbf16>
    %21 = arith.extf %20 : vector<128x128xbf16> to vector<128x128xf32>
    %cst_19 = arith.constant dense<0.000000e+00> : vector<8x768xf32>
    %22 = tpu.matmul %9, %15, %cst_19 {dimension_numbers = #tpu.dot_dimension_numbers<[1], [0], [0], [1], [0, 0, 1, 1], [], []>} : vector<8x768xf32>, vector<768x768xf32>, vector<8x768xf32> -> vector<8x768xf32>
    %23 = vector.broadcast %10 : vector<1x768xf32> to vector<8x768xf32>
    %24 = arith.addf %22, %23 : vector<8x768xf32>
    %25 = math.tanh %24 : vector<8x768xf32>
    %cst_20 = arith.constant dense<0.000000e+00> : vector<8x256xf32>
    %26 = tpu.matmul %25, %17, %cst_20 {dimension_numbers = #tpu.dot_dimension_numbers<[1], [0], [0], [1], [0, 0, 1, 1], [], []>} : vector<8x768xf32>, vector<768x256xf32>, vector<8x256xf32> -> vector<8x256xf32>
    %27 = vector.broadcast %11 : vector<1x256xf32> to vector<8x256xf32>
    %28 = arith.addf %26, %27 : vector<8x256xf32>
    %cst_21 = arith.constant dense<0.000000e+00> : vector<8x128xf32>
    %29 = tpu.matmul %28, %19, %cst_21 {dimension_numbers = #tpu.dot_dimension_numbers<[1], [0], [0], [1], [0, 0, 1, 1], [], []>} : vector<8x256xf32>, vector<256x128xf32>, vector<8x128xf32> -> vector<8x128xf32>
    %30 = vector.broadcast %12 : vector<1x128xf32> to vector<8x128xf32>
    %31 = arith.addf %29, %30 : vector<8x128xf32>
    %cst_22 = arith.constant dense<0.000000e+00> : vector<8x128xf32>
    %32 = tpu.matmul %31, %21, %cst_22 {dimension_numbers = #tpu.dot_dimension_numbers<[1], [0], [0], [1], [0, 0, 1, 1], [], []>} : vector<8x128xf32>, vector<128x128xf32>, vector<8x128xf32> -> vector<8x128xf32>
    %33 = vector.broadcast %13 : vector<1x128xf32> to vector<8x128xf32>
    %34 = arith.addf %32, %33 : vector<8x128xf32>
    %c0_23 = arith.constant 0 : index
    %c0_24 = arith.constant 0 : index
    %35 = vector.load %arg5[%c0_23, %c0_24] : memref<8x128xf32, #tpu.memory_space<vmem>>, vector<8x128xf32>
    tpu.vector_store %arg5[%c0_23, %c0_24], %34 {strides = array<i32>} : memref<8x128xf32, #tpu.memory_space<vmem>>, vector<8x128xf32>,
    return
  }
}

</mosaic_0001>

<bundles_post_ra>
// kernel: code_bert_classifier_forward.1
= control target key start
LH: loop header
LB: loop body
LE: loop exit
PB: predicated region body
PF: predicated region fallthrough
CT: control target
= control target key end

     0   :  { %vm452_vm0 = vcmask 7168   ;;  %v4428_v0 = vmov 0   ;;  %vm1944_vm1 = vcmask 1041409   ;;  %vm1946_vm2 = vcmask 1042434   ;;  %s6541_s1 = inlined_call_operand.vmem [shape: f32[8,8,1], index: 1, kind: input, shape index: {}]   ;;  %s6542_s2 = inlined_call_operand.vmem [shape: bf16[768,1024], index: 2, kind: input, shape index: {}]   ;;  %s6543_s0 = inlined_call_operand.vmem [shape: f32[8,8,768], index: 0, kind: input, shape index: {}]   ;;  %s6544_s4 = inlined_call_operand.vmem [shape: f32[1,1280], index: 4, kind: input, shape index: {}]   ;;  %s6545_s3 = inlined_call_operand.vmem [shape: bf16[256,256], index: 3, kind: input, shape index: {}]   ;;  %s6546_s5 = inlined_call_operand.vmem [shape: f32[8,128], index: 5, kind: output, shape index: {}]  }
   0x1   :  { %4375 = vset.pattern.permute.xlu1 %v4428_v0  ;;  %4374 = vset.pattern.permute.xlu0 %v4428_v0  ;;  %v70_v1 = vld [vmem:[%s6541_s1 + $0x10] sm:$0xff]  ;;  %v68_v2 = vld [vmem:[%s6541_s1] sm:$0xff]  ;;  %v71_v3 = vld [vmem:[%s6541_s1 + $0x18] sm:$0xff]  ;;  %vm1948_vm3 = vcmask 1043459   ;;  %vm1950_vm4 = vcmask 1044484   ;;  %vm1952_vm5 = vcmask 1045509  }
   0x2   :  { %88 = vperm.xlu1 %4375, %v70_v1   ;;  %v467_v4 = vsel %vm452_vm0, %v70_v1, 0.0  ;;  %78 = vperm.xlu0 %4374, %v68_v2   ;;  %v453_v5 = vsel %vm452_vm0, %v68_v2, 0.0  ;;  %v474_v6 = vsel %vm452_vm0, %v71_v3, 0.0  ;;  %v69_v7 = vld [vmem:[%s6541_s1 + $0x8] sm:$0xff]  ;;  %v72_v9 = vld [vmem:[%s6541_s1 + $0x20] sm:$0xff]  ;;  %v74_v14 = vld [vmem:[%s6541_s1 + $0x30] sm:$0xff] }
   0x3   :  { %v73_v8 = vld [vmem:[%s6541_s1 + $0x28] sm:$0xff]  ;;  %v468_v10 = vrot.slane %v467_v4, 4  ;;  %v454_v11 = vrot.slane %v453_v5, 4  ;;  %v475_v12 = vrot.slane %v474_v6, 4  ;;  %v460_v13 = vsel %vm452_vm0, %v69_v7, 0.0  ;;  %v4490_v15 = vld [vmem:[%s6541_s1 + $0x38] sm:$0xff] }
   0x4   :  { %v461_v16 = vrot.slane %v460_v13, 4  ;;  %v488_v17 = vsel %vm452_vm0, %v73_v8, 0.0  ;;  %v481_v18 = vsel %vm452_vm0, %v72_v9, 0.0  ;;  %v495_v19 = vsel %vm452_vm0, %v74_v14, 0.0  ;;  %v617_v52 = vld [vmem:[%s6542_s2] sm:$0xff]  ;;  %v618_v58 = vld [vmem:[%s6542_s2 + $0x8] sm:$0xff] }
   0x5   :  { %v469_v20 = vadd.f32 %v468_v10, %v467_v4  ;;  %v455_v21 = vadd.f32 %v454_v11, %v453_v5  ;;  %v476_v22 = vadd.f32 %v475_v12, %v474_v6  ;;  %v489_v23 = vrot.slane %v488_v17, 4  ;;  %v620_v57 = vld [vmem:[%s6542_s2 + $0x20] sm:$0xff]  ;;  %v621_v59 = vld [vmem:[%s6542_s2 + $0x28] sm:$0xff] }
   0x6   :  { %93 = vperm.xlu1 %4375, %v71_v3   ;;  %v462_v24 = vadd.f32 %v461_v16, %v460_v13  ;;  %83 = vperm.xlu0 %4374, %v69_v7   ;;  %v482_v25 = vrot.slane %v481_v18, 4  ;;  %v496_v26 = vrot.slane %v495_v19, 4  ;;  %v502_v27 = vsel %vm452_vm0, %v4490_v15, 0.0  ;;  %v623_v61 = vld [vmem:[%s6542_s2 + $0x40] sm:$0xff]  ;;  %v624_v2 = vld [vmem:[%s6542_s2 + $0x48] sm:$0xff] }
   0x7   :  { %v470_v28 = vrot.slane %v469_v20, 2  ;;  %v456_v29 = vrot.slane %v455_v21, 2  ;;  %v477_v30 = vrot.slane %v476_v22, 2  ;;  %v490_v31 = vadd.f32 %v489_v23, %v488_v17  ;;  %v626_v1 = vld [vmem:[%s6542_s2 + $0x60] sm:$0xff]  ;;  %v627_v3 = vld [vmem:[%s6542_s2 + $0x68] sm:$0xff] }
   0x8   :  { %v463_v32 = vrot.slane %v462_v24, 2  ;;  %v483_v33 = vadd.f32 %v482_v25, %v481_v18  ;;  %v497_v34 = vadd.f32 %v496_v26, %v495_v19  ;;  %v503_v35 = vrot.slane %v502_v27, 4  ;;  %v632_v13 = vld [vmem:[%s6542_s2 + $0xa0] sm:$0xff]  ;;  %v633_v16 = vld [vmem:[%s6542_s2 + $0xa8] sm:$0xff] }
   0x9   :  { %v471_v36 = vadd.f32 %v470_v28, %v469_v20  ;;  %v457_v37 = vadd.f32 %v456_v29, %v455_v21  ;;  %v478_v38 = vadd.f32 %v477_v30, %v476_v22  ;;  %v491_v39 = vrot.slane %v490_v31, 2  ;;  %v638_v29 = vld [vmem:[%s6542_s2 + $0xe0] sm:$0xff]  ;;  %v636_v30 = vld [vmem:[%s6542_s2 + $0xc8] sm:$0xff] }
   0xa   :  { %v464_v40 = vadd.f32 %v463_v32, %v462_v24  ;;  %103 = vperm.xlu1 %4375, %v73_v8   ;;  %v484_v41 = vrot.slane %v483_v33, 2  ;;  %98 = vperm.xlu0 %4374, %v72_v9   ;;  %v504_v42 = vadd.f32 %v503_v35, %v502_v27  ;;  %v498_v46 = vrot.slane %v497_v34, 2  ;;  %v629_v8 = vld [vmem:[%s6542_s2 + $0x80] sm:$0xff] }
   0xb   :  { %v492_v43 = vadd.f32 %v491_v39, %v490_v31  ;;  %v458_v44 = vrot.slane %v457_v37, 1  ;;  %v472_v45 = vrot.slane %v471_v36, 1  ;;  %v479_v49 = vrot.slane %v478_v38, 1  ;;  %v635_v24 = vld [vmem:[%s6542_s2 + $0xc0] sm:$0xff]  ;;  %v639_v31 = vld [vmem:[%s6542_s2 + $0xe8] sm:$0xff] }
   0xc   :  { %v465_v47 = vrot.slane %v464_v40, 1  ;;  %v505_v48 = vrot.slane %v504_v42, 2  ;;  %v485_v50 = vadd.f32 %v484_v41, %v483_v33  ;;  %v499_v62 = vadd.f32 %v498_v46, %v497_v34  ;;  %v641_v35 = vld [vmem:[%s6542_s2 + $0x100] sm:$0xff]  ;;  %v645_v41 = vld [vmem:[%s6542_s2 + $0x128] sm:$0xff] }
   0xd   :  { %v459_v51 = vadd.f32 %v458_v44, %v457_v37  ;;  %v473_v54 = vadd.f32 %v472_v45, %v471_v36  ;;  %v493_v56 = vrot.slane %v492_v43, 1  ;;  %v480_v0 = vadd.f32 %v479_v49, %v478_v38  ;;  %v644_v39 = vld [vmem:[%s6542_s2 + $0x120] sm:$0xff]  ;;  %v648_v49 = vld [vmem:[%s6542_s2 + $0x148] sm:$0xff] }
   0xe   :  { %108 = vperm.xlu1 %4375, %v74_v14   ;;  %v466_v53 = vadd.f32 %v465_v47, %v464_v40  ;;  %v506_v55 = vadd.f32 %v505_v48, %v504_v42  ;;  %v486_v4 = vrot.slane %v485_v50, 1  ;;  %v3962_v5 = vcombine.high %v617_v52, %v620_v57  ;;  %v630_v14 = vld [vmem:[%s6542_s2 + $0x88] sm:$0xff]  ;;  %v647_v46 = vld [vmem:[%s6542_s2 + $0x140] sm:$0xff] }
   0xf   :  { %v509_v60 = vmax.f32 %v459_v51, 1.0  ;;  %v4058_v6 = vcombine.high %v618_v58, %v621_v59  ;;  %v3963_v7 = vcombine.low %v617_v52, %v620_v57  ;;  %v511_v9 = vmax.f32 %v473_v54, 1.0  ;;  %v642_v40 = vld [vmem:[%s6542_s2 + $0x108] sm:$0xff]  ;;  %v650_v48 = vld [vmem:[%s6542_s2 + $0x160] sm:$0xff] }
  0x10   :  { %v510_v63 = vmax.f32 %v466_v53, 1.0  ;;  %v494_v10 = vadd.f32 %v493_v56, %v492_v43  ;;  %v507_v11 = vrot.slane %v506_v55, 1  ;;  %v4059_v12 = vcombine.low %v618_v58, %v621_v59  ;;  %3115 = vmatprep.subr.bf16.mxu0 %v3962_v5  ;;  %v656_v56 = vld [vmem:[%s6542_s2 + $0x1a0] sm:$0xff]  ;;  %v654_v57 = vld [vmem:[%s6542_s2 + $0x188] sm:$0xff] }
  0x11   :  { %3307 = vmatprep.subr.bf16.mxu1 %v4058_v6  ;;  %v3964_v17 = vcombine.high %v623_v61, %v626_v1  ;;  %v4060_v18 = vcombine.high %v624_v2, %v627_v3  ;;  %3117 = vmatpush1.bf16.msra.mxu0 %v3963_v7  ;;  %v3965_v19 = vcombine.low %v623_v61, %v626_v1  ;;  %v500_v21 = vrot.slane %v499_v62, 1  ;;  %v657_v58 = vld [vmem:[%s6542_s2 + $0x1a8] sm:$0xff]  ;;  %v659_v1 = vld [vmem:[%s6542_s2 + $0x1c0] sm:$0xff] }
  0x12   :  { %524 = vperm.xlu0 %4374, %v510_v63   ;;  %519 = vperm.xlu1 %4375, %v509_v60   ;;  %v4061_v20 = vcombine.low %v624_v2, %v627_v3  ;;  %v3966_v22 = vcombine.high %v629_v8, %v632_v13  ;;  %v4062_v23 = vcombine.high %v630_v14, %v633_v16  ;;  %v512_v25 = vmax.f32 %v480_v0, 1.0  ;;  %v662_v2 = vld [vmem:[%s6542_s2 + $0x1e0] sm:$0xff]  ;;  %v660_v3 = vld [vmem:[%s6542_s2 + $0x1c8] sm:$0xff] }
  0x13   :  { %3309 = vmatpush1.bf16.msra.mxu1 %v4059_v12  ;;  %3119 = vmatprep.subr.bf16.mxu0 %v3964_v17  ;;  %v514_v26 = vmax.f32 %v494_v10, 1.0  ;;  %v487_v27 = vadd.f32 %v486_v4, %v485_v50  ;;  %v508_v28 = vadd.f32 %v507_v11, %v506_v55  ;;  %v3967_v32 = vcombine.low %v629_v8, %v632_v13  ;;  %v651_v50 = vld [vmem:[%s6542_s2 + $0x168] sm:$0xff]  ;;  %v653_v55 = vld [vmem:[%s6542_s2 + $0x180] sm:$0xff] }
  0x14   :  { %3311 = vmatprep.subr.bf16.mxu1 %v4060_v18  ;;  %v3968_v33 = vcombine.high %v635_v24, %v638_v29  ;;  %v4064_v34 = vcombine.high %v636_v30, %v639_v31  ;;  %v501_v38 = vadd.f32 %v500_v21, %v499_v62  ;;  %v3969_v42 = vcombine.low %v635_v24, %v638_v29  ;;  %v663_v5 = vld [vmem:[%s6542_s2 + $0x1e8] sm:$0xff]  ;;  %v668_v10 = vld [vmem:[%s6542_s2 + $0x220] sm:$0xff] }
  0x15   :  { %3121 = vmatpush1.bf16.msra.mxu0 %v3965_v19  ;;  %v513_v36 = vmax.f32 %v487_v27, 1.0  ;;  %v516_v37 = vmax.f32 %v508_v28, 1.0  ;;  %v4065_v43 = vcombine.low %v636_v30, %v639_v31  ;;  %v3970_v44 = vcombine.high %v641_v35, %v644_v39  ;;  %v666_v11 = vld [vmem:[%s6542_s2 + $0x208] sm:$0xff]  ;;  %v671_v18 = vld [vmem:[%s6542_s2 + $0x240] sm:$0xff] }
  0x16   :  { %529 = vperm.xlu0 %4374, %v511_v9   ;;  %113 = vperm.xlu1 %4375, %v4490_v15   ;;  %v4063_v15 = vcombine.low %v630_v14, %v633_v16  ;;  %v4066_v45 = vcombine.high %v642_v40, %v645_v41  ;;  %v515_v47 = vmax.f32 %v501_v38, 1.0  ;;  %v3971_v51 = vcombine.low %v641_v35, %v644_v39  ;;  %v665_v9 = vld [vmem:[%s6542_s2 + $0x200] sm:$0xff]  ;;  %v669_v13 = vld [vmem:[%s6542_s2 + $0x228] sm:$0xff] }
  0x17   :  { %3313 = vmatpush1.bf16.msra.mxu1 %v4061_v20  ;;  %3123 = vmatprep.subr.bf16.mxu0 %v3966_v22  ;;  %v4067_v52 = vcombine.low %v642_v40, %v645_v41  ;;  %v3972_v53 = vcombine.high %v647_v46, %v650_v48  ;;  %v4068_v54 = vcombine.high %v648_v49, %v651_v50  ;;  %v674_v19 = vld [vmem:[%s6542_s2 + $0x260] sm:$0xff]  ;;  %v672_v20 = vld [vmem:[%s6542_s2 + $0x248] sm:$0xff]  ;;  %vm1954_vm6 = vcmask 1046534  }
  0x18   :  { %3315 = vmatprep.subr.bf16.mxu1 %v4062_v23  ;;  %v3973_v59 = vcombine.low %v647_v46, %v650_v48  ;;  %v4069_v60 = vcombine.low %v648_v49, %v651_v50  ;;  %v3974_v61 = vcombine.high %v653_v55, %v656_v56  ;;  %v4070_v62 = vcombine.high %v654_v57, %v657_v58  ;;  %v675_v22 = vld [vmem:[%s6542_s2 + $0x268] sm:$0xff]  ;;  %v680_v27 = vld [vmem:[%s6542_s2 + $0x2a0] sm:$0xff] }
  0x19   :  { %3125 = vmatpush1.bf16.msra.mxu0 %v3967_v32  ;;  %v3975_v63 = vcombine.low %v653_v55, %v656_v56  ;;  %v4071_v0 = vcombine.low %v654_v57, %v657_v58  ;;  %v3976_v4 = vcombine.high %v659_v1, %v662_v2  ;;  %v4072_v6 = vcombine.high %v660_v3, %v663_v5  ;;  %v678_v28 = vld [vmem:[%s6542_s2 + $0x288] sm:$0xff]  ;;  %v689_v39 = vld [vmem:[%s6542_s2 + $0x300] sm:$0xff] }
  0x1a   :  { %534 = vperm.xlu0 %4374, %v512_v25   ;;  %544 = vperm.xlu1 %4375, %v514_v26   ;;  %v3977_v7 = vcombine.low %v659_v1, %v662_v2  ;;  %v4073_v8 = vcombine.low %v660_v3, %v663_v5  ;;  %v3978_v12 = vcombine.high %v665_v9, %v668_v10  ;;  %v677_v26 = vld [vmem:[%s6542_s2 + $0x280] sm:$0xff]  ;;  %v681_v30 = vld [vmem:[%s6542_s2 + $0x2a8] sm:$0xff]  ;;  %vm1956_vm7 = vcmask 1047559  }
  0x1b   :  { %3317 = vmatpush1.bf16.msra.mxu1 %v4063_v15  ;;  %3127 = vmatprep.subr.bf16.mxu0 %v3968_v33  ;;  %v4074_v14 = vcombine.high %v666_v11, %v669_v13  ;;  %v3979_v16 = vcombine.low %v665_v9, %v668_v10  ;;  %v4075_v17 = vcombine.low %v666_v11, %v669_v13  ;;  %v683_v33 = vld [vmem:[%s6542_s2 + $0x2c0] sm:$0xff]  ;;  %v684_v35 = vld [vmem:[%s6542_s2 + $0x2c8] sm:$0xff]  ;;  %vm4430_vm8 = vmmov 0  }
  0x1c   :  { %3319 = vmatprep.subr.bf16.mxu1 %v4064_v34  ;;  %v3980_v21 = vcombine.high %v671_v18, %v674_v19  ;;  %v4076_v23 = vcombine.high %v672_v20, %v675_v22  ;;  %v3981_v24 = vcombine.low %v671_v18, %v674_v19  ;;  %v4077_v25 = vcombine.low %v672_v20, %v675_v22  ;;  %v686_v34 = vld [vmem:[%s6542_s2 + $0x2e0] sm:$0xff]  ;;  %v696_v49 = vld [vmem:[%s6542_s2 + $0x348] sm:$0xff]  ;;  %v34_v18 = vld [vmem:[%s6543_s0 + $0x70] sm:$0xff] }
  0x1d   :  { %3129 = vmatpush1.bf16.msra.mxu0 %v3969_v42  ;;  %v3982_v29 = vcombine.high %v677_v26, %v680_v27  ;;  %v4078_v31 = vcombine.high %v678_v28, %v681_v30  ;;  %v3983_v32 = vcombine.low %v677_v26, %v680_v27  ;;  %v4079_v15 = vcombine.low %v678_v28, %v681_v30  ;;  %v692_v40 = vld [vmem:[%s6542_s2 + $0x320] sm:$0xff]  ;;  %v699_v50 = vld [vmem:[%s6542_s2 + $0x368] sm:$0xff] }
  0x1e   :  { %539 = vperm.xlu0 %4374, %v513_v36   ;;  %554 = vperm.xlu1 %4375, %v516_v37   ;;  %v3984_v36 = vcombine.high %v683_v33, %v686_v34  ;;  %v687_v37 = vld [vmem:[%s6542_s2 + $0x2e8] sm:$0xff]  ;;  %v3985_v38 = vcombine.low %v683_v33, %v686_v34  ;;  %v698_v48 = vld [vmem:[%s6542_s2 + $0x360] sm:$0xff]  ;;  %v35_v33 = vld [vmem:[%s6543_s0 + $0x78] sm:$0xff] }
  0x1f   :  { %3321 = vmatpush1.bf16.msra.mxu1 %v4065_v43  ;;  %3131 = vmatprep.subr.bf16.mxu0 %v3970_v44  ;;  %v4080_v41 = vcombine.high %v684_v35, %v687_v37  ;;  %v4081_v42 = vcombine.low %v684_v35, %v687_v37  ;;  %v3986_v43 = vcombine.high %v689_v39, %v692_v40  ;;  %v690_v44 = vld [vmem:[%s6542_s2 + $0x308] sm:$0xff]  ;;  %v701_v55 = vld [vmem:[%s6542_s2 + $0x380] sm:$0xff] }
  0x20   :  { %3323 = vmatprep.subr.bf16.mxu1 %v4066_v45  ;;  %v693_v45 = vld [vmem:[%s6542_s2 + $0x328] sm:$0xff]  ;;  %v704_v56 = vld [vmem:[%s6542_s2 + $0x3a0] sm:$0xff] }
  0x21   :  { %3133 = vmatpush1.bf16.msra.mxu0 %v3971_v51  ;;  %v4082_v46 = vcombine.high %v690_v44, %v693_v45  ;;  %v3987_v51 = vcombine.low %v689_v39, %v692_v40  ;;  %v702_v57 = vld [vmem:[%s6542_s2 + $0x388] sm:$0xff]  ;;  %v3991_v3 = vcombine.low %v701_v55, %v704_v56  ;;  %v36_v19 = vld [vmem:[%s6543_s0 + $0x80] sm:$0xff] }
  0x22   :  { %549 = vperm.xlu0 %4374, %v515_v47   ;;  %3135 = vmatprep.subr.bf16.mxu0 %v3972_v53  ;;  %v695_v47 = vld [vmem:[%s6542_s2 + $0x340] sm:$0xff]  ;;  %v705_v58 = vld [vmem:[%s6542_s2 + $0x3a8] sm:$0xff] }
  0x23   :  { %3325 = vmatpush1.bf16.msra.mxu1 %v4067_v52  ;;  %v4083_v52 = vcombine.low %v690_v44, %v693_v45  ;;  %v3988_v53 = vcombine.high %v695_v47, %v698_v48  ;;  %v708_v1 = vld [vmem:[%s6542_s2 + $0x3c8] sm:$0xff]  ;;  %v24_v27 = vld [vmem:[%s6543_s0 + $0x20] sm:$0xff] }
  0x24   :  { %3327 = vmatprep.subr.bf16.mxu1 %v4068_v54  ;;  %v4084_v54 = vcombine.high %v696_v49, %v699_v50  ;;  %v711_v2 = vld [vmem:[%s6542_s2 + $0x3e8] sm:$0xff]  ;;  %v32_v30 = vld [vmem:[%s6543_s0 + $0x60] sm:$0xff] }
  0x25   :  { %3137 = vmatpush1.bf16.msra.mxu0 %v3973_v59  ;;  %v3989_v59 = vcombine.low %v695_v47, %v698_v48  ;;  %v4703_v9 = vld [vmem:[%s6542_s2 + $0x408] sm:$0xff]  ;;  %v4089_v13 = vcombine.low %v708_v1, %v711_v2  ;;  %v4765_v34 = vld [vmem:[%s6542_s2 + $0x440] sm:$0xff] }
  0x26   :  { %3139 = vmatprep.subr.bf16.mxu0 %v3974_v61  ;;  %v3990_v61 = vcombine.high %v701_v55, %v704_v56  ;;  %v37_v20 = vld [vmem:[%s6543_s0 + $0x88] sm:$0xff]  ;;  %v4770_v35 = vld [vmem:[%s6542_s2 + $0x460] sm:$0xff] }
  0x27   :  { %3329 = vmatpush1.bf16.msra.mxu1 %v4069_v60  ;;  %v4085_v60 = vcombine.low %v696_v49, %v699_v50  ;;  %v25_v28 = vld [vmem:[%s6543_s0 + $0x28] sm:$0xff]  ;;  %v4785_v39 = vld [vmem:[%s6542_s2 + $0x480] sm:$0xff] }
  0x28   :  { %3331 = vmatprep.subr.bf16.mxu1 %v4070_v62  ;;  %v4086_v62 = vcombine.high %v702_v57, %v705_v58  ;;  %v4775_v37 = vld [vmem:[%s6542_s2 + $0x448] sm:$0xff]  ;;  %6618 = vst [vmem:[#allocation3_spill] sm:$0xff] %v4785_v39  ;;  %v4790_v40 = vld [vmem:[%s6542_s2 + $0x4a0] sm:$0xff] }
  0x29   :  { %3141 = vmatpush1.bf16.msra.mxu0 %v3975_v63  ;;  %v707_v63 = vld [vmem:[%s6542_s2 + $0x3c0] sm:$0xff]  ;;  %6619 = vst [vmem:[#allocation4_spill] sm:$0xff] %v4790_v40  ;;  %v21_v56 = vld [vmem:[%s6543_s0 + $0x8] sm:$0xff] }
  0x2a   :  { %3143 = vmatprep.subr.bf16.mxu0 %v3976_v4  ;;  %v4087_v4 = vcombine.low %v702_v57, %v705_v58  ;;  %v4805_v44 = vld [vmem:[%s6542_s2 + $0x4c0] sm:$0xff] }
  0x2b   :  { %3333 = vmatpush1.bf16.msra.mxu1 %v4071_v0  ;;  %v710_v0 = vld [vmem:[%s6542_s2 + $0x3e0] sm:$0xff]  ;;  %6622 = vst [vmem:[#allocation7_spill] sm:$0xff] %v4805_v44 }
  0x2c   :  { %3335 = vmatprep.subr.bf16.mxu1 %v4072_v6  ;;  %v3992_v5 = vcombine.high %v707_v63, %v710_v0  ;;  %v4088_v6 = vcombine.high %v708_v1, %v711_v2  ;;  %v3993_v10 = vcombine.low %v707_v63, %v710_v0  ;;  %v4810_v45 = vld [vmem:[%s6542_s2 + $0x4e0] sm:$0xff]  ;;  %v4861_v0 = vld [vmem:[%s6542_s2 + $0x508] sm:$0xff] }
  0x2d   :  { %3145 = vmatpush1.bf16.msra.mxu0 %v3977_v7  ;;  %v4693_v7 = vld [vmem:[%s6542_s2 + $0x400] sm:$0xff]  ;;  %6623 = vst [vmem:[#allocation8_spill] sm:$0xff] %v4810_v45  ;;  %6628 = vst [vmem:[#allocation13_spill] sm:$0xff] %v4861_v0  ;;  %v4866_v1 = vld [vmem:[%s6542_s2 + $0x528] sm:$0xff] }
  0x2e   :  { %3147 = vmatprep.subr.bf16.mxu0 %v3978_v12  ;;  %v4710_v12 = vld [vmem:[%s6542_s2 + $0x428] sm:$0xff]  ;;  %v20_v55 = vld [vmem:[%s6543_s0] sm:$0xff]  ;;  %6629 = vst [vmem:[#allocation14_spill] sm:$0xff] %v4866_v1 }
  0x2f   :  { %3337 = vmatpush1.bf16.msra.mxu1 %v4073_v8  ;;  %v4698_v8 = vld [vmem:[%s6542_s2 + $0x420] sm:$0xff] }
  0x30   :  { %3339 = vmatprep.subr.bf16.mxu1 %v4074_v14  ;;  %v3994_v14 = vcombine.high %v4693_v7, %v4698_v8  ;;  %v4871_v2 = vld [vmem:[%s6542_s2 + $0x540] sm:$0xff] }
  0x31   :  { %3149 = vmatpush1.bf16.msra.mxu0 %v3979_v16  ;;  %6630 = vst [vmem:[#allocation15_spill] sm:$0xff] %v4871_v2  ;;  %v5004_v57 = vld [vmem:[%s6542_s2 + $0x620] sm:$0xff] }
  0x32   :  { %3151 = vmatprep.subr.bf16.mxu0 %v3980_v21  ;;  %6644 = vst [vmem:[#allocation29_spill] sm:$0xff] %v5004_v57 }
  0x33   :  { %3341 = vmatpush1.bf16.msra.mxu1 %v4075_v17  ;;  %v4090_v17 = vcombine.high %v4703_v9, %v4710_v12 }
  0x34   :  { %3343 = vmatprep.subr.bf16.mxu1 %v4076_v23 }
  0x35   :  { %3153 = vmatpush1.bf16.msra.mxu0 %v3981_v24  ;;  %v22_v24 = vld [vmem:[%s6543_s0 + $0x10] sm:$0xff] }
  0x36   :  { %3155 = vmatprep.subr.bf16.mxu0 %v3982_v29 }
  0x37   :  { %3345 = vmatpush1.bf16.msra.mxu1 %v4077_v25 }
  0x38   :  { %3347 = vmatprep.subr.bf16.mxu1 %v4078_v31  ;;  %v33_v31 = vld [vmem:[%s6543_s0 + $0x68] sm:$0xff] }
  0x39   :  { %3157 = vmatpush1.bf16.msra.mxu0 %v3983_v32 }
  0x3a   :  { %3159 = vmatprep.subr.bf16.mxu0 %v3984_v36 }
  0x3b   :  { %3349 = vmatpush1.bf16.msra.mxu1 %v4079_v15 }
  0x3c   :  { %3351 = vmatprep.subr.bf16.mxu1 %v4080_v41  ;;  %v4795_v41 = vld [vmem:[%s6542_s2 + $0x488] sm:$0xff] }
  0x3d   :  { %3161 = vmatpush1.bf16.msra.mxu0 %v3985_v38  ;;  %v4780_v38 = vld [vmem:[%s6542_s2 + $0x468] sm:$0xff]  ;;  %6620 = vst [vmem:[#allocation5_spill] sm:$0xff] %v4795_v41 }
  0x3e   :  { %3163 = vmatprep.subr.bf16.mxu0 %v3986_v43 }
  0x3f   :  { %3353 = vmatpush1.bf16.msra.mxu1 %v4081_v42  ;;  %v4800_v42 = vld [vmem:[%s6542_s2 + $0x4a8] sm:$0xff] }
  0x40   :  { %3355 = vmatprep.subr.bf16.mxu1 %v4082_v46  ;;  %6621 = vst [vmem:[#allocation6_spill] sm:$0xff] %v4800_v42  ;;  %v4815_v46 = vld [vmem:[%s6542_s2 + $0x4c8] sm:$0xff] }
  0x41   :  { %3165 = vmatpush1.bf16.msra.mxu0 %v3987_v51  ;;  %6624 = vst [vmem:[#allocation9_spill] sm:$0xff] %v4815_v46  ;;  %v4826_v51 = vld [vmem:[%s6542_s2 + $0x4e8] sm:$0xff] }
  0x42   :  { %3167 = vmatprep.subr.bf16.mxu0 %v3988_v53  ;;  %6625 = vst [vmem:[#allocation10_spill] sm:$0xff] %v4826_v51  ;;  %v4836_v53 = vld [vmem:[%s6542_s2 + $0x520] sm:$0xff] }
  0x43   :  { %3357 = vmatpush1.bf16.msra.mxu1 %v4083_v52  ;;  %v4831_v52 = vld [vmem:[%s6542_s2 + $0x500] sm:$0xff]  ;;  %6627 = vst [vmem:[#allocation12_spill] sm:$0xff] %v4836_v53 }
  0x44   :  { %3359 = vmatprep.subr.bf16.mxu1 %v4084_v54  ;;  %6626 = vst [vmem:[#allocation11_spill] sm:$0xff] %v4831_v52 }
  0x45   :  { %3169 = vmatpush1.bf16.msra.mxu0 %v3989_v59 }
  0x46   :  { %3171 = vmatprep.subr.bf16.mxu0 %v3990_v61 }
  0x47   :  { %3361 = vmatpush1.bf16.msra.mxu1 %v4085_v60 }
  0x48   :  { %3363 = vmatprep.subr.bf16.mxu1 %v4086_v62  ;;  %v4963_v62 = vld [vmem:[%s6542_s2 + $0x5e0] sm:$0xff] }
  0x49   :  { %3173 = vmatpush1.bf16.msra.mxu0 %v3991_v3  ;;  %6639 = vst [vmem:[#allocation24_spill] sm:$0xff] %v4963_v62 }
  0x4a   :  { %3175 = vmatprep.subr.bf16.mxu0 %v3992_v5  ;;  %v4958_v5 = vld [vmem:[%s6542_s2 + $0x5c0] sm:$0xff] }
  0x4b   :  { %3365 = vmatpush1.bf16.msra.mxu1 %v4087_v4  ;;  %6638 = vst [vmem:[#allocation23_spill] sm:$0xff] %v4958_v5 }
  0x4c   :  { %3367 = vmatprep.subr.bf16.mxu1 %v4088_v6  ;;  %v42_v6 = vld [vmem:[%s6543_s0 + $0xb0] sm:$0xff] }
  0x4d   :  { %3177 = vmatpush1.bf16.msra.mxu0 %v3993_v10  ;;  %v4882_v10 = vld [vmem:[%s6542_s2 + $0x560] sm:$0xff] }
  0x4e   :  { %3179 = vmatprep.subr.bf16.mxu0 %v3994_v14  ;;  %6631 = vst [vmem:[#allocation16_spill] sm:$0xff] %v4882_v10  ;;  %v4892_v14 = vld [vmem:[%s6542_s2 + $0x568] sm:$0xff] }
  0x4f   :  { %3369 = vmatpush1.bf16.msra.mxu1 %v4089_v13  ;;  %v4887_v13 = vld [vmem:[%s6542_s2 + $0x548] sm:$0xff]  ;;  %6633 = vst [vmem:[#allocation18_spill] sm:$0xff] %v4892_v14 }
  0x50   :  { %3371 = vmatprep.subr.bf16.mxu1 %v4090_v17  ;;  %6632 = vst [vmem:[#allocation17_spill] sm:$0xff] %v4887_v13 }
  0x81   :  { %v89_v21 = vpop.permute.xlu1 %88  ;;  %v4729_v23 = vpop.permute.xlu0 %78 }
  0x82   :  { %v4727_v22 = vmul.f32 %v89_v21, %v34_v18  ;;  %v4734_v25 = vmul.f32 %v89_v21, %v36_v19  ;;  %v4736_v26 = vmul.f32 %v89_v21, %v37_v20  ;;  %v4745_v29 = vmul.f32 %v4729_v23, %v22_v24  ;;  %v23_v20 = vld [vmem:[%s6543_s0 + $0x18] sm:$0xff] }
  0x83   :  { %v4754_v32 = vmul.f32 %v4729_v23, %v24_v27  ;;  %v4757_v15 = vmul.f32 %v4729_v23, %v25_v28  ;;  %v128_v36 = vmul.f32 %v89_v21, %v32_v30  ;;  %v129_v43 = vmul.f32 %v89_v21, %v33_v31  ;;  %v40_v27 = vld [vmem:[%s6543_s0 + $0xa0] sm:$0xff] }
  0x84   :  { %v131_v47 = vmul.f32 %v89_v21, %v35_v33  ;;  %v248_v17 = vrot.slane %v4727_v22, 4  ;;  %v266_v19 = vrot.slane %v4736_v26, 4  ;;  %v116_v21 = vmul.f32 %v4729_v23, %v20_v55  ;;  %v43_v55 = vld [vmem:[%s6543_s0 + $0xb8] sm:$0xff]  ;;  %v4927_v31 = vld [vmem:[%s6542_s2 + $0x580] sm:$0xff] }
  0x85   :  { %6617 = vst [vmem:[#allocation2_spill] sm:$0xff] %v4754_v32  ;;  %v236_v54 = vrot.slane %v128_v36, 4  ;;  %v242_v3 = vrot.slane %v129_v43, 4  ;;  %v4900_v24 = vpop.permute.xlu1 %93  ;;  %v117_v30 = vmul.f32 %v4729_v23, %v21_v56  ;;  %6634 = vst [vmem:[#allocation19_spill] sm:$0xff] %v4927_v31  ;;  %v119_v63 = vmul.f32 %v4729_v23, %v23_v20  ;;  %v4943_v56 = vld [vmem:[%s6542_s2 + $0x588] sm:$0xff] }
  0x86   :  { %v254_v18 = vrot.slane %v131_v47, 4  ;;  %v4931_v4 = vmul.f32 %v4900_v24, %v40_v27  ;;  %6636 = vst [vmem:[#allocation21_spill] sm:$0xff] %v4943_v56  ;;  %v4948_v23 = vld [vmem:[%s6542_s2 + $0x5a8] sm:$0xff]  ;;  %v267_v20 = vadd.f32 %v266_v19, %v4736_v26  ;;  %v164_v27 = vrot.slane %v116_v21, 4 }
  0x87   :  { %v237_v28 = vadd.f32 %v236_v54, %v128_v36  ;;  %v243_v33 = vadd.f32 %v242_v3, %v129_v43  ;;  %v4938_v54 = vld [vmem:[%s6542_s2 + $0x5a0] sm:$0xff]  ;;  %6637 = vst [vmem:[#allocation22_spill] sm:$0xff] %v4948_v23  ;;  %v249_v43 = vadd.f32 %v248_v17, %v4727_v22  ;;  %v38_v36 = vld [vmem:[%s6543_s0 + $0x90] sm:$0xff]  ;;  %v170_v22 = vrot.slane %v117_v30, 4  ;;  %v39_v17 = vld [vmem:[%s6543_s0 + $0x98] sm:$0xff] }
  0x88   :  { %6635 = vst [vmem:[#allocation20_spill] sm:$0xff] %v4938_v54  ;;  %v255_v3 = vadd.f32 %v254_v18, %v131_v47  ;;  %v4966_v47 = vmul.f32 %v4900_v24, %v42_v6  ;;  %v4969_v26 = vmul.f32 %v4900_v24, %v43_v55  ;;  %v260_v60 = vrot.slane %v4734_v25, 4  ;;  %v4989_v18 = vld [vmem:[%s6542_s2 + $0x5c8] sm:$0xff] }
  0x89   :  { %v238_v61 = vrot.slane %v237_v28, 2  ;;  %v182_v55 = vrot.slane %v119_v63, 4  ;;  %v134_v58 = vmul.f32 %v4900_v24, %v38_v36  ;;  %6641 = vst [vmem:[#allocation26_spill] sm:$0xff] %v4989_v18  ;;  %v4994_v19 = vld [vmem:[%s6542_s2 + $0x5e8] sm:$0xff]  ;;  %v244_v59 = vrot.slane %v243_v33, 2  ;;  %v4999_v36 = vld [vmem:[%s6542_s2 + $0x600] sm:$0xff] }
  0x8a   :  { %6640 = vst [vmem:[#allocation25_spill] sm:$0xff] %v4966_v47  ;;  %6642 = vst [vmem:[#allocation27_spill] sm:$0xff] %v4994_v19  ;;  %v250_v6 = vrot.slane %v249_v43, 2  ;;  %v256_v49 = vrot.slane %v255_v3, 2  ;;  %v165_v50 = vadd.f32 %v164_v27, %v116_v21  ;;  %v268_v16 = vrot.slane %v267_v20, 2 }
  0x8b   :  { %6643 = vst [vmem:[#allocation28_spill] sm:$0xff] %v4999_v36  ;;  %v239_v48 = vadd.f32 %v238_v61, %v237_v28  ;;  %v171_v11 = vadd.f32 %v170_v22, %v117_v30  ;;  %v135_v23 = vmul.f32 %v4900_v24, %v39_v17  ;;  %v176_v56 = vrot.slane %v4745_v29, 4  ;;  %v41_v61 = vld [vmem:[%s6543_s0 + $0xa8] sm:$0xff]  ;;  %v84_v30 = vpop.permute.xlu0 %83  ;;  %v28_v22 = vld [vmem:[%s6543_s0 + $0x40] sm:$0xff] }
  0x8c   :  { %v5015_v31 = vadd.f32 %v260_v60, %v4734_v25  ;;  %v183_v14 = vadd.f32 %v182_v55, %v119_v63  ;;  %v272_v28 = vrot.slane %v134_v58, 4  ;;  %v245_v21 = vadd.f32 %v244_v59, %v243_v33  ;;  %v30_v60 = vld [vmem:[%s6543_s0 + $0x50] sm:$0xff]  ;;  %v31_v63 = vld [vmem:[%s6543_s0 + $0x58] sm:$0xff] }
  0x8d   :  { %v5025_v27 = vadd.f32 %v250_v6, %v249_v43  ;;  %v257_v54 = vadd.f32 %v256_v49, %v255_v3  ;;  %v166_v25 = vrot.slane %v165_v50, 2  ;;  %v240_v55 = vrot.slane %v239_v48, 1  ;;  %v26_v59 = vld [vmem:[%s6543_s0 + $0x30] sm:$0xff]  ;;  %v27_v3 = vld [vmem:[%s6543_s0 + $0x38] sm:$0xff] }
  0x8e   :  { %6645 = vst [vmem:[#allocation30_spill] sm:$0xff] %v5015_v31  ;;  %v5033_v31 = vadd.f32 %v268_v16, %v267_v20  ;;  %v172_v19 = vrot.slane %v171_v11, 2  ;;  %v278_v18 = vrot.slane %v135_v23, 4  ;;  %v177_v49 = vadd.f32 %v176_v56, %v4745_v29  ;;  %v29_v16 = vld [vmem:[%s6543_s0 + $0x48] sm:$0xff] }
  0x8f   :  { %6646 = vst [vmem:[#allocation31_spill] sm:$0xff] %v5025_v27  ;;  %v194_v33 = vrot.slane %v4757_v15, 4  ;;  %v137_v43 = vmul.f32 %v4900_v24, %v41_v61  ;;  %v5047_v20 = vmul.f32 %v84_v30, %v28_v22  ;;  %v184_v6 = vrot.slane %v183_v14, 2 }
  0x90   :  { %6647 = vst [vmem:[#allocation32_spill] sm:$0xff] %v5033_v31  ;;  %v273_v17 = vadd.f32 %v272_v28, %v134_v58  ;;  %v5049_v36 = vmul.f32 %v84_v30, %v30_v60  ;;  %v5051_v57 = vmul.f32 %v84_v30, %v31_v63  ;;  %v246_v29 = vrot.slane %v245_v21, 1 }
  0x91   :  { %v167_v24 = vadd.f32 %v166_v25, %v165_v50  ;;  %v122_v61 = vmul.f32 %v84_v30, %v26_v59  ;;  %v279_v62 = vadd.f32 %v278_v18, %v135_v23  ;;  %v284_v5 = vrot.slane %v4931_v4, 4 }
  0x92   :  { %6648 = vst [vmem:[#allocation33_spill] sm:$0xff] %v5049_v36  ;;  %v123_v13 = vmul.f32 %v84_v30, %v27_v3  ;;  %v125_v10 = vmul.f32 %v84_v30, %v29_v16  ;;  %v258_v2 = vrot.slane %v257_v54, 1  ;;  %v173_v47 = vadd.f32 %v172_v19, %v171_v11  ;;  %v104_v36 = vpop.permute.xlu1 %103 }
  0x93   :  { %v195_v22 = vadd.f32 %v194_v33, %v4757_v15  ;;  %v290_v32 = vrot.slane %v137_v43, 4  ;;  %v178_v28 = vrot.slane %v177_v49, 2  ;;  %v185_v60 = vadd.f32 %v184_v6, %v183_v14  ;;  %v52_v15 = vld [vmem:[%s6543_s0 + $0x100] sm:$0xff] }
  0x94   :  { %v274_v63 = vrot.slane %v273_v17, 2  ;;  %v5057_v1 = vadd.f32 %v240_v55, %v239_v48  ;;  %v5059_v50 = vadd.f32 %v246_v29, %v245_v21  ;;  %v168_v23 = vrot.slane %v167_v24, 1  ;;  %v99_v48 = vpop.permute.xlu0 %98 }
  0x95   :  { %v200_v18 = vrot.slane %v122_v61, 4  ;;  %v280_v25 = vrot.slane %v279_v62, 2  ;;  %v285_v30 = vadd.f32 %v284_v5, %v4931_v4  ;;  %v206_v59 = vrot.slane %v123_v13, 4  ;;  %v54_v4 = vld [vmem:[%s6543_s0 + $0x110] sm:$0xff] }
  0x96   :  { %v218_v11 = vrot.slane %v125_v10, 4  ;;  %v5065_v19 = vadd.f32 %v258_v2, %v257_v54  ;;  %v174_v14 = vrot.slane %v173_v47, 1  ;;  %v196_v33 = vrot.slane %v195_v22, 2 }
  0x97   :  { %v291_v3 = vadd.f32 %v290_v32, %v137_v43  ;;  %v5067_v55 = vadd.f32 %v178_v28, %v177_v49  ;;  %v186_v21 = vrot.slane %v185_v60, 1  ;;  %v5069_v16 = vadd.f32 %v274_v63, %v273_v17  ;;  %v55_v17 = vld [vmem:[%s6543_s0 + $0x118] sm:$0xff]  ;;  %v5085_v63 = vpop.permute.xlu1 %108 }
  0x98   :  { %v302_v6 = vrot.slane %v4969_v26, 4  ;;  %v5075_v5 = vadd.f32 %v168_v23, %v167_v24  ;;  %v201_v29 = vadd.f32 %v200_v18, %v122_v61  ;;  %v212_v2 = vrot.slane %v5047_v20, 4  ;;  %v5093_v18 = vpop.permute.xlu0 %524 }
  0x99   :  { %6649 = vst [vmem:[#allocation34_spill] sm:$0xff] %v5067_v55  ;;  %v5078_v54 = vmul.f32 %v104_v36, %v52_v15  ;;  %v5080_v32 = vadd.f32 %v280_v25, %v279_v62  ;;  %v286_v49 = vrot.slane %v285_v30, 2  ;;  %v207_v43 = vadd.f32 %v206_v59, %v123_v13  ;;  %v44_v59 = vld [vmem:[%s6543_s0 + $0xc0] sm:$0xff] }
  0x9a   :  { %v219_v28 = vadd.f32 %v218_v11, %v125_v10  ;;  %v5087_v58 = vadd.f32 %v174_v14, %v173_v47  ;;  %v5089_v24 = vadd.f32 %v196_v33, %v195_v22  ;;  %v292_v61 = vrot.slane %v291_v3, 2  ;;  %v50_v47 = vld [vmem:[%s6543_s0 + $0xf0] sm:$0xff]  ;;  %v51_v22 = vld [vmem:[%s6543_s0 + $0xf8] sm:$0xff]  ;;  %v45_v33 = vld [vmem:[%s6543_s0 + $0xc8] sm:$0xff] }
  0x9b   :  { %v5091_v23 = vmul.f32 %v104_v36, %v54_v4  ;;  %v5096_v25 = vadd.f32 %v186_v21, %v185_v60  ;;  %v303_v13 = vadd.f32 %v302_v6, %v4969_v26  ;;  %v202_v11 = vrot.slane %v201_v29, 2  ;;  %v53_v26 = vld [vmem:[%s6543_s0 + $0x108] sm:$0xff]  ;;  %v46_v21 = vld [vmem:[%s6543_s0 + $0xd0] sm:$0xff] }
  0x9c   :  { %6650 = vst [vmem:[#allocation35_spill] sm:$0xff] %v5089_v24  ;;  %v213_v60 = vadd.f32 %v212_v2, %v5047_v20  ;;  %v230_v15 = vrot.slane %v5051_v57, 4  ;;  %v5114_v14 = vmul.f32 %v104_v36, %v55_v17  ;;  %v5123_v4 = vadd.f32 %v286_v49, %v285_v30  ;;  %v47_v17 = vld [vmem:[%s6543_s0 + $0xd8] sm:$0xff]  ;;  %v49_v30 = vld [vmem:[%s6543_s0 + $0xe8] sm:$0xff]  ;;  %v5142_v51 = vpop.permute.xlu0 %529 }
  0x9d   :  { %6651 = vst [vmem:[#allocation36_spill] sm:$0xff] %v5091_v23  ;;  %v208_v20 = vrot.slane %v207_v43, 2  ;;  %v220_v2 = vrot.slane %v219_v28, 2  ;;  %v5125_v62 = vadd.f32 %v292_v61, %v291_v3  ;;  %v146_v56 = vmul.f32 %v104_v36, %v50_v47  ;;  %v48_v23 = vld [vmem:[%s6543_s0 + $0xe0] sm:$0xff]  ;;  %v5136_v61 = vpop.permute.xlu1 %519 }
  0x9e   :  { %v147_v10 = vmul.f32 %v104_v36, %v51_v22  ;;  %v140_v31 = vmul.f32 %v99_v48, %v44_v59  ;;  %v304_v0 = vrot.slane %v303_v13, 2  ;;  %v149_v53 = vmul.f32 %v104_v36, %v53_v26 }
  0x9f   :  { %v141_v49 = vmul.f32 %v99_v48, %v45_v33  ;;  %v142_v3 = vmul.f32 %v99_v48, %v46_v21  ;;  %v203_v47 = vadd.f32 %v202_v11, %v201_v29  ;;  %v214_v22 = vrot.slane %v213_v60, 2 }
  0xa0   :  { %v5139_v6 = vadd.f32 %v230_v15, %v5051_v57  ;;  %v356_v52 = vrot.slane %v5078_v54, 4  ;;  %v209_v59 = vadd.f32 %v208_v20, %v207_v43  ;;  %v221_v46 = vadd.f32 %v220_v2, %v219_v28  ;;  %v58_v57 = vld [vmem:[%s6543_s0 + $0x130] sm:$0xff] }
  0xa1   :  { %v143_v36 = vmul.f32 %v99_v48, %v47_v17  ;;  %v5144_v26 = vmul.f32 %v99_v48, %v48_v23  ;;  %v344_v45 = vrot.slane %v146_v56, 4  ;;  %v350_v44 = vrot.slane %v147_v10, 4  ;;  %v57_v17 = vld [vmem:[%s6543_s0 + $0x128] sm:$0xff]  ;;  %v114_v15 = vpop.permute.xlu1 %113 }
  0xa2   :  { %v145_v33 = vmul.f32 %v99_v48, %v49_v30  ;;  %v308_v21 = vrot.slane %v140_v31, 4  ;;  %v362_v55 = vrot.slane %v149_v53, 4  ;;  %v314_v24 = vrot.slane %v141_v49, 4  ;;  %v60_v30 = vld [vmem:[%s6543_s0 + $0x140] sm:$0xff] }
  0xa3   :  { %6652 = vst [vmem:[#allocation37_spill] sm:$0xff] %v5144_v26  ;;  %v320_v29 = vrot.slane %v142_v3, 4  ;;  %v326_v11 = vrot.slane %v143_v36, 4  ;;  %v5150_v27 = vadd.f32 %v304_v0, %v303_v13  ;;  %v5152_v43 = vadd.f32 %v214_v22, %v213_v60 }
  0xa4   :  { %v357_v28 = vadd.f32 %v356_v52, %v5078_v54  ;;  %v204_v23 = vrot.slane %v203_v47, 1  ;;  %v309_v20 = vadd.f32 %v308_v21, %v140_v31  ;;  %v315_v2 = vadd.f32 %v314_v24, %v141_v49  ;;  %v56_v52 = vld [vmem:[%s6543_s0 + $0x120] sm:$0xff]  ;;  %v61_v31 = vld [vmem:[%s6543_s0 + $0x148] sm:$0xff]  ;;  %v535_v24 = vpop.permute.xlu0 %534 }
  0xa5   :  { %6653 = vst [vmem:[#allocation38_spill] sm:$0xff] %v5150_v27  ;;  %v210_v0 = vrot.slane %v209_v59, 1  ;;  %v222_v13 = vrot.slane %v221_v46, 1  ;;  %v5162_v60 = vadd.f32 %v344_v45, %v146_v56  ;;  %v5171_v54 = vmul.f32 %v5085_v63, %v58_v57  ;;  %v59_v45 = vld [vmem:[%s6543_s0 + $0x138] sm:$0xff] }
  0xa6   :  { %v5173_v49 = vadd.f32 %v350_v44, %v147_v10  ;;  %v5175_v22 = vadd.f32 %v362_v55, %v149_v53  ;;  %v321_v21 = vadd.f32 %v320_v29, %v142_v3  ;;  %v327_v48 = vadd.f32 %v326_v11, %v143_v36 }
  0xa7   :  { %v358_v56 = vrot.slane %v357_v28, 2  ;;  %v338_v26 = vrot.slane %v145_v33, 4  ;;  %v153_v27 = vmul.f32 %v5085_v63, %v57_v17  ;;  %v5182_v42 = vmul.f32 %v5085_v63, %v60_v30 }
  0xa8   :  { %v310_v57 = vrot.slane %v309_v20, 2  ;;  %v316_v41 = vrot.slane %v315_v2, 2  ;;  %v152_v44 = vmul.f32 %v5085_v63, %v56_v52  ;;  %v5186_v53 = vmul.f32 %v5085_v63, %v61_v31  ;;  %v62_v52 = vld [vmem:[%s6543_s0 + $0x150] sm:$0xff]  ;;  %v540_v31 = vpop.permute.xlu0 %539 }
  0xa9   :  { %6654 = vst [vmem:[#allocation39_spill] sm:$0xff] %v5182_v42  ;;  %v5188_v55 = vadd.f32 %v204_v23, %v203_v47  ;;  %v5190_v10 = vadd.f32 %v210_v0, %v209_v59  ;;  %v5192_v3 = vadd.f32 %v222_v13, %v221_v46  ;;  %v155_v36 = vmul.f32 %v5085_v63, %v59_v45  ;;  %v63_v47 = vld [vmem:[%s6543_s0 + $0x158] sm:$0xff]  ;;  %v545_v59 = vpop.permute.xlu1 %544  ;;  %v64_v13 = vld [vmem:[%s6543_s0 + $0x160] sm:$0xff] }
  0xaa   :  { %6655 = vst [vmem:[#allocation40_spill] sm:$0xff] %v5186_v53  ;;  %v346_v29 = vrot.slane %v5162_v60, 2  ;;  %v352_v11 = vrot.slane %v5173_v49, 2  ;;  %v322_v17 = vrot.slane %v321_v21, 2  ;;  %v328_v30 = vrot.slane %v327_v48, 2 }
  0xab   :  { %v5203_v23 = vadd.f32 %v358_v56, %v357_v28  ;;  %v5206_v63 = vadd.f32 %v338_v26, %v145_v33  ;;  %v386_v0 = vrot.slane %v153_v27, 4  ;;  %v311_v45 = vadd.f32 %v310_v57, %v309_v20  ;;  %v65_v28 = vld [vmem:[%s6543_s0 + $0x168] sm:$0xff]  ;;  %v66_v26 = vld [vmem:[%s6543_s0 + $0x170] sm:$0xff]  ;;  %v67_v33 = vld [vmem:[%s6543_s0 + $0x178] sm:$0xff] }
  0xac   :  { %v317_v42 = vadd.f32 %v316_v41, %v315_v2  ;;  %v380_v40 = vrot.slane %v152_v44, 4  ;;  %4400 = vrcp.f32 %v5093_v18  ;;  %v398_v56 = vrot.slane %v155_v36, 4 }
  0xad   :  { %6656 = vst [vmem:[#allocation41_spill] sm:$0xff] %v5203_v23  ;;  %6657 = vst [vmem:[#allocation42_spill] sm:$0xff] %v5206_v63  ;;  %4402 = vrcp.f32 %v5136_v61  ;;  %v158_v20 = vmul.f32 %v114_v15, %v62_v52  ;;  %v159_v41 = vmul.f32 %v114_v15, %v63_v47  ;;  %v5222_v2 = vadd.f32 %v322_v17, %v321_v21  ;;  %v555_v21 = vpop.permute.xlu1 %554 }
  0xae   :  { %v5224_v18 = vadd.f32 %v328_v30, %v327_v48  ;;  %4404 = vrcp.f32 %v5142_v51  ;;  %v5227_v57 = vmul.f32 %v114_v15, %v64_v13  ;;  %v387_v46 = vadd.f32 %v386_v0, %v153_v27  ;;  %v550_v27 = vpop.permute.xlu0 %549 }
  0xaf   :  { %v5229_v23 = vmul.f32 %v114_v15, %v65_v28  ;;  %v5231_v39 = vmul.f32 %v114_v15, %v66_v26  ;;  %v5233_v53 = vmul.f32 %v114_v15, %v67_v33  ;;  %v381_v63 = vadd.f32 %v380_v40, %v152_v44 }
  0xb0   :  { %v392_v61 = vrot.slane %v5171_v54, 4  ;;  %v422_v52 = vrot.slane %v159_v41, 4  ;;  %4406 = vrcp.f32 %v535_v24  ;;  %v5236_v48 = vadd.f32 %v398_v56, %v155_v36 }
  0xb1   :  { %v416_v51 = vrot.slane %v158_v20, 4  ;;  %v428_v17 = vrot.slane %v5227_v57, 4  ;;  %4408 = vrcp.f32 %v545_v59  ;;  %v6658_v15 = vrot.slane %v5080_v32, 1 }
  0xb2   :  { %4410 = vrcp.f32 %v540_v31  ;;  %v318_v47 = vrot.slane %v317_v42, 1  ;;  %v353_v40 = vadd.f32 %v352_v11, %v5173_v49  ;;  %v434_v24 = vrot.slane %v5229_v23, 4 }
  0xb3   :  { %v283_v30 = vadd.f32 %v6658_v15, %v5080_v32  ;;  %4412 = vrcp.f32 %v555_v21  ;;  %v388_v44 = vrot.slane %v387_v46, 2  ;;  %v423_v36 = vadd.f32 %v422_v52, %v159_v41 }
  0xb4   :  { %4414 = vrcp.f32 %v550_v27  ;;  %v319_v0 = vadd.f32 %v318_v47, %v317_v42  ;;  %v354_v13 = vrot.slane %v353_v40, 1  ;;  %v6659_v59 = vrot.slane %v5069_v16, 1 }
  0xb5   :  { %v389_v28 = vadd.f32 %v388_v44, %v387_v46  ;;  %v424_v26 = vrot.slane %v423_v36, 2  ;;  %v312_v32 = vrot.slane %v311_v45, 1  ;;  %v347_v49 = vadd.f32 %v346_v29, %v5162_v60 }
  0xb6   :  { %v277_v31 = vadd.f32 %v6659_v59, %v5069_v16  ;;  %v5248_v11 = vpop.eup %4400  ;;  %v355_v33 = vadd.f32 %v354_v13, %v353_v40  ;;  %v382_v56 = vrot.slane %v381_v63, 2  ;;  %v417_v41 = vadd.f32 %v416_v51, %v158_v20 }
  0xb7   :  { %v6660_v42 = vrot.slane %v5125_v62, 1  ;;  %v5255_v21 = vpop.eup %4402  ;;  %v390_v16 = vrot.slane %v389_v28, 1  ;;  %v425_v46 = vadd.f32 %v424_v26, %v423_v36  ;;  %v566_v27 = vmul.f32 %v5248_v11, %v5190_v10 }
  0xb8   :  { %v313_v60 = vadd.f32 %v312_v32, %v311_v45  ;;  %v5259_v29 = vpop.eup %4404  ;;  %v559_v15 = vmul.f32 %v5255_v21, %v5087_v58  ;;  %v348_v20 = vrot.slane %v347_v49, 1  ;;  %v383_v51 = vadd.f32 %v382_v56, %v381_v63 }
  0xb9   :  { %v5253_v52 = vadd.f32 %v6660_v42, %v5125_v62  ;;  %v418_v47 = vrot.slane %v417_v41, 2  ;;  %v391_v40 = vadd.f32 %v390_v16, %v389_v28  ;;  %v426_v62 = vrot.slane %v425_v46, 1 }
  0xba   :  { %v573_v44 = vmul.f32 %v5259_v29, %v5059_v50  ;;  %v558_v36 = vmul.f32 %v5255_v21, %v5075_v5  ;;  %v5267_v13 = vpop.eup %4406  ;;  %v1958_v10 = vsel %vm1944_vm1, %v566_v27, %v559_v15  ;;  %v349_v45 = vadd.f32 %v348_v20, %v347_v49 }
  0xbb   :  { %v384_v59 = vrot.slane %v383_v51, 1  ;;  %v419_v26 = vadd.f32 %v418_v47, %v417_v41  ;;  %v5270_v32 = vpop.eup %4408  ;;  %v427_v58 = vadd.f32 %v426_v62, %v425_v46  ;;  %v580_v63 = vmul.f32 %v5267_v13, %v283_v30 }
  0xbc   :  { %v1959_v28 = vsel %vm1946_vm2, %v573_v44, %v1958_v10  ;;  %v565_v50 = vmul.f32 %v5248_v11, %v5188_v55  ;;  %v5276_v56 = vpop.eup %4410  ;;  %v594_v5 = vmul.f32 %v5270_v32, %v355_v33  ;;  %v572_v49 = vmul.f32 %v5259_v29, %v5057_v1 }
  0xbd   :  { %v385_v42 = vadd.f32 %v384_v59, %v383_v51  ;;  %v420_v16 = vrot.slane %v419_v26, 1  ;;  %v5281_v41 = vpop.eup %4412  ;;  %v587_v46 = vmul.f32 %v5276_v56, %v319_v0  ;;  %v1960_v30 = vsel %vm1948_vm3, %v580_v63, %v1959_v28 }
  0xbe   :  { %v579_v27 = vmul.f32 %v5267_v13, %v277_v31  ;;  %v586_v15 = vmul.f32 %v5276_v56, %v313_v60  ;;  %v5287_v55 = vpop.eup %4414  ;;  %v608_v20 = vmul.f32 %v5281_v41, %v427_v58  ;;  %v593_v51 = vmul.f32 %v5270_v32, %v349_v45 }
  0xbf   :  { %v421_v33 = vadd.f32 %v420_v16, %v419_v26  ;;  %v1945_v47 = vsel %vm1944_vm1, %v565_v50, %v558_v36  ;;  %v601_v1 = vmul.f32 %v5287_v55, %v391_v40  ;;  %v1961_v62 = vsel %vm1950_vm4, %v587_v46, %v1960_v30 }
  0xc0   :  { %v600_v0 = vmul.f32 %v5287_v55, %v385_v42  ;;  %v1947_v44 = vsel %vm1946_vm2, %v572_v49, %v1945_v47  ;;  %v1962_v31 = vsel %vm1952_vm5, %v594_v5, %v1961_v62  ;;  %v330_v59 = vrot.slane %v5224_v18, 1 }
  0xc1   :  { %v607_v60 = vmul.f32 %v5281_v41, %v421_v33  ;;  %v1949_v10 = vsel %vm1948_vm3, %v579_v27, %v1947_v44  ;;  %v1963_v45 = vsel %vm1954_vm6, %v601_v1, %v1962_v31  ;;  %v6661_v40 = vrot.slane %v5175_v22, 2 }
  0xc2   :  { %v1951_v36 = vsel %vm1950_vm4, %v586_v15, %v1949_v10  ;;  %v400_v58 = vrot.slane %v5236_v48, 2  ;;  %v5307_v63 = vsel %vm1956_vm7, %v608_v20, %v1963_v45  ;;  %v331_v50 = vadd.f32 %v330_v59, %v5224_v18  ;;  %v6668_v59 = vld [vmem:[#allocation40_spill] sm:$0xff] }
  0xc3   :  { %v365_v26 = vadd.f32 %v6661_v40, %v5175_v22  ;;  %v1953_v28 = vsel %vm1952_vm5, %v593_v51, %v1951_v36  ;;  %v435_v5 = vadd.f32 %v434_v24, %v5229_v23  ;;  %2063 = vmatprep.mubr.f32.mxu0 %v5307_v63  ;;  %2276 = vmatprep.mubr.f32.mxu1 %v5307_v63  ;;  %v288_v15 = vrot.slane %v5123_v4, 1 }
  0xc4   :  { %v1955_v42 = vsel %vm1954_vm6, %v600_v0, %v1953_v28  ;;  %v401_v16 = vadd.f32 %v400_v58, %v5236_v48  ;;  %v561_v49 = vmul.f32 %v5255_v21, %v5096_v25  ;;  %v568_v30 = vmul.f32 %v5248_v11, %v5192_v3  ;;  %v6667_v0 = vld [vmem:[#allocation42_spill] sm:$0xff] }
  0xc5   :  { %v366_v22 = vrot.slane %v365_v26, 1  ;;  %v5321_v46 = vsel %vm1956_vm7, %v607_v60, %v1955_v42  ;;  %v436_v18 = vrot.slane %v435_v5, 2  ;;  %v575_v23 = vmul.f32 %v5259_v29, %v5065_v19 }
  0xc6   :  { %v393_v24 = vadd.f32 %v392_v61, %v5171_v54  ;;  %2064 = vmatmul.mubr.f32.vlgmr.msra.gmra.mrb[0].mxu0 %v5321_v46  ;;  %2277 = vmatmul.mubr.f32.vlgmr.msra.gmra.mrb[0].mxu1 %v5321_v46  ;;  %v402_v48 = vrot.slane %v401_v16, 1  ;;  %v582_v25 = vmul.f32 %v5267_v13, %v5253_v52  ;;  %v589_v27 = vmul.f32 %v5276_v56, %v331_v50  ;;  %v6671_v50 = vld [vmem:[#allocation3_spill] sm:$0xff] }
  0xc7   :  { %v6662_v3 = vcombine.low %v4693_v7, %v4698_v8  ;;  %v6663_v19 = vcombine.low %v4703_v9, %v4710_v12  ;;  %v367_v54 = vadd.f32 %v366_v22, %v365_v26  ;;  %v437_v61 = vadd.f32 %v436_v18, %v435_v5  ;;  %v6672_v5 = vld [vmem:[#allocation4_spill] sm:$0xff]  ;;  %v6674_v22 = vld [vmem:[#allocation5_spill] sm:$0xff] }
  0xc8   :  { %v1972_v20 = vsel %vm1944_vm1, %v568_v30, %v561_v49  ;;  %v216_v33 = vrot.slane %v5152_v43, 1  ;;  %v429_v52 = vadd.f32 %v428_v17, %v5227_v57  ;;  %v403_v51 = vadd.f32 %v402_v48, %v401_v16  ;;  %v6675_v16 = vld [vmem:[#allocation6_spill] sm:$0xff]  ;;  %v6677_v18 = vld [vmem:[#allocation41_spill] sm:$0xff] }
  0xc9   :  { %3181 = vmatpush1.bf16.msra.mxu0 %v6662_v3  ;;  %3373 = vmatpush1.bf16.msra.mxu1 %v6663_v19  ;;  %v1973_v47 = vsel %vm1946_vm2, %v575_v23, %v1972_v20  ;;  %v6664_v7 = vcombine.high %v4765_v34, %v4770_v35  ;;  %v6665_v8 = vcombine.high %v4775_v37, %v4780_v38  ;;  %v374_v9 = vrot.slane %v5114_v14, 4  ;;  %v6681_v3 = vld [vmem:[#allocation34_spill] sm:$0xff] }
  0xca   :  { %v438_v12 = vrot.slane %v437_v61, 1  ;;  %v596_v1 = vmul.f32 %v5270_v32, %v367_v54  ;;  %v1974_v62 = vsel %vm1948_vm3, %v582_v25, %v1973_v47  ;;  %v6666_v57 = vrot.slane %v5139_v6, 2  ;;  %v6683_v47 = vld [vmem:[#allocation38_spill] sm:$0xff] }
  0xcb   :  { %3183 = vmatprep.subr.bf16.mxu0 %v6664_v7  ;;  %3375 = vmatprep.subr.bf16.mxu1 %v6665_v8  ;;  %v340_v44 = vrot.slane %v6667_v0, 2  ;;  %v603_v31 = vmul.f32 %v5287_v55, %v403_v51  ;;  %v1975_v60 = vsel %vm1950_vm4, %v589_v27, %v1974_v62  ;;  %v324_v10 = vrot.slane %v5222_v2, 1 }
  0xcc   :  { %v233_v17 = vadd.f32 %v6666_v57, %v5139_v6  ;;  %v410_v45 = vrot.slane %v6668_v59, 4  ;;  %v439_v36 = vadd.f32 %v438_v12, %v437_v61  ;;  %v1976_v40 = vsel %vm1952_vm5, %v596_v1, %v1975_v60  ;;  %v6686_v57 = vld [vmem:[#allocation7_spill] sm:$0xff]  ;;  %v6690_v60 = vld [vmem:[#allocation10_spill] sm:$0xff] }
  0xcd   :  { %v6669_v26 = vcombine.low %v4765_v34, %v4770_v35  ;;  %v6670_v6 = vcombine.low %v4775_v37, %v4780_v38  ;;  %v394_v58 = vrot.slane %v393_v24, 2  ;;  %v1977_v28 = vsel %vm1954_vm6, %v603_v31, %v1976_v40  ;;  %v6678_v34 = vld [vmem:[#allocation31_spill] sm:$0xff]  ;;  %v6689_v31 = vld [vmem:[#allocation9_spill] sm:$0xff] }
  0xce   :  { %v6673_v42 = vcombine.high %v6671_v50, %v6672_v5  ;;  %v6676_v49 = vcombine.high %v6674_v22, %v6675_v16  ;;  %v360_v30 = vrot.slane %v6677_v18, 1  ;;  %v430_v23 = vrot.slane %v429_v52, 2  ;;  %v6680_v37 = vld [vmem:[#allocation35_spill] sm:$0xff] }
  0xcf   :  { %3185 = vmatpush1.bf16.msra.mxu0 %v6669_v26  ;;  %3377 = vmatpush1.bf16.msra.mxu1 %v6670_v6  ;;  %v6679_v35 = vrot.slane %v6678_v34, 1  ;;  %v198_v38 = vrot.slane %v6680_v37, 1  ;;  %v375_v25 = vadd.f32 %v374_v9, %v5114_v14  ;;  %v610_v27 = vmul.f32 %v5281_v41, %v439_v36 }
  0xd0   :  { %3187 = vmatprep.subr.bf16.mxu0 %v6673_v42  ;;  %3379 = vmatprep.subr.bf16.mxu1 %v6676_v49  ;;  %v6682_v19 = vrot.slane %v6681_v3, 1  ;;  %v289_v61 = vadd.f32 %v288_v15, %v5123_v4  ;;  %v217_v20 = vadd.f32 %v216_v33, %v5152_v43  ;;  %v341_v51 = vadd.f32 %v340_v44, %v6667_v0  ;;  %v6687_v0 = vld [vmem:[#allocation8_spill] sm:$0xff]  ;;  %v6694_v42 = vld [vmem:[#allocation11_spill] sm:$0xff]  ;;  %v6697_v49 = vld [vmem:[#allocation13_spill] sm:$0xff] }
  0xd1   :  { %v253_v48 = vadd.f32 %v6679_v35, %v6678_v34  ;;  %v306_v7 = vrot.slane %v6683_v47, 1  ;;  %v411_v8 = vadd.f32 %v410_v45, %v6668_v59  ;;  %v5395_v12 = vsel %vm1956_vm7, %v610_v27, %v1977_v28  ;;  %v6700_v27 = vld [vmem:[#allocation32_spill] sm:$0xff] }
  0xd2   :  { %v181_v54 = vadd.f32 %v6682_v19, %v6681_v3  ;;  %v6684_v14 = vcombine.low %v6671_v50, %v6672_v5  ;;  %v6685_v9 = vcombine.low %v6674_v22, %v6675_v16  ;;  %v325_v4 = vadd.f32 %v324_v10, %v5222_v2  ;;  %2134 = vmatprep.mubr.f32.mxu0 %v5395_v12  ;;  %v6695_v22 = vld [vmem:[#allocation12_spill] sm:$0xff] }
  0xd3   :  { %v234_v43 = vrot.slane %v233_v17, 1  ;;  %2347 = vmatprep.mubr.f32.mxu1 %v5395_v12  ;;  %v361_v15 = vadd.f32 %v360_v30, %v6677_v18  ;;  %v395_v33 = vadd.f32 %v394_v58, %v393_v24  ;;  %v431_v1 = vadd.f32 %v430_v23, %v429_v52  ;;  %v6698_v18 = vld [vmem:[#allocation14_spill] sm:$0xff] }
  0xd4   :  { %3189 = vmatpush1.bf16.msra.mxu0 %v6684_v14  ;;  %3381 = vmatpush1.bf16.msra.mxu1 %v6685_v9  ;;  %v376_v62 = vrot.slane %v375_v25, 2  ;;  %v6688_v44 = vcombine.high %v6686_v57, %v6687_v0  ;;  %v6691_v59 = vcombine.high %v6689_v31, %v6690_v60  ;;  %v560_v2 = vmul.f32 %v5255_v21, %v181_v54 }
  0xd5   :  { %v567_v10 = vmul.f32 %v5248_v11, %v217_v20  ;;  %v574_v45 = vmul.f32 %v5259_v29, %v253_v48  ;;  %v396_v36 = vrot.slane %v395_v33, 1  ;;  %v432_v40 = vrot.slane %v431_v1, 1 }
  0xd6   :  { %3191 = vmatprep.subr.bf16.mxu0 %v6688_v44  ;;  %3383 = vmatprep.subr.bf16.mxu1 %v6691_v59  ;;  %v581_v24 = vmul.f32 %v5267_v13, %v289_v61  ;;  %v588_v52 = vmul.f32 %v5276_v56, %v325_v4  ;;  %v446_v26 = vrot.slane %v5233_v53, 4  ;;  %v6692_v6 = vcombine.low %v6686_v57, %v6687_v0  ;;  %v6705_v0 = vld [vmem:[#allocation25_spill] sm:$0xff] }
  0xd7   :  { %v6693_v58 = vcombine.low %v6689_v31, %v6690_v60  ;;  %v595_v28 = vmul.f32 %v5270_v32, %v361_v15  ;;  %v1965_v50 = vsel %vm1944_vm1, %v567_v10, %v560_v2  ;;  %v342_v5 = vrot.slane %v341_v51, 1  ;;  %v6706_v31 = vld [vmem:[#allocation15_spill] sm:$0xff]  ;;  %v6707_v60 = vld [vmem:[#allocation16_spill] sm:$0xff] }
  0xd8   :  { %3193 = vmatpush1.bf16.msra.mxu0 %v6692_v6  ;;  %v6696_v16 = vcombine.high %v6694_v42, %v6695_v22  ;;  %v6699_v30 = vcombine.high %v6697_v49, %v6698_v18  ;;  %v397_v23 = vadd.f32 %v396_v36, %v395_v33  ;;  %v433_v34 = vadd.f32 %v432_v40, %v431_v1  ;;  %v6702_v33 = vld [vmem:[#allocation2_spill] sm:$0xff] }
  0xd9   :  { %3385 = vmatpush1.bf16.msra.mxu1 %v6693_v58  ;;  %v1966_v35 = vsel %vm1946_vm2, %v574_v45, %v1965_v50  ;;  %v412_v48 = vrot.slane %v411_v8, 2  ;;  %v6701_v3 = vrot.slane %v6700_v27, 1  ;;  %v199_v54 = vadd.f32 %v198_v38, %v6680_v37 }
  0xda   :  { %3195 = vmatprep.subr.bf16.mxu0 %v6696_v16  ;;  %3387 = vmatprep.subr.bf16.mxu1 %v6699_v30  ;;  %v235_v61 = vadd.f32 %v234_v43, %v233_v17  ;;  %v1967_v20 = vsel %vm1948_vm3, %v581_v24, %v1966_v35  ;;  %v602_v14 = vmul.f32 %v5287_v55, %v397_v23  ;;  %v188_v1 = vrot.slane %v6702_v33, 4  ;;  %v6716_v16 = vld [vmem:[#allocation20_spill] sm:$0xff]  ;;  %v6719_v30 = vld [vmem:[#allocation22_spill] sm:$0xff] }
  0xdb   :  { %v271_v19 = vadd.f32 %v6701_v3, %v6700_v27  ;;  %v609_v9 = vmul.f32 %v5281_v41, %v433_v34  ;;  %v1968_v4 = vsel %vm1950_vm4, %v588_v52, %v1967_v20  ;;  %v307_v15 = vadd.f32 %v306_v7, %v6683_v47  ;;  %v6709_v47 = vld [vmem:[#allocation17_spill] sm:$0xff]  ;;  %v6710_v7 = vld [vmem:[#allocation18_spill] sm:$0xff]  ;;  %v6721_v27 = vld [vmem:[#allocation36_spill] sm:$0xff] }
  0xdc   :  { %v6703_v57 = vcombine.low %v6694_v42, %v6695_v22  ;;  %v6704_v37 = vcombine.low %v6697_v49, %v6698_v18  ;;  %v1969_v17 = vsel %vm1952_vm5, %v595_v28, %v1968_v4  ;;  %v343_v38 = vadd.f32 %v342_v5, %v341_v51  ;;  %v6712_v28 = vld [vmem:[#allocation33_spill] sm:$0xff]  ;;  %v6715_v22 = vld [vmem:[#allocation19_spill] sm:$0xff] }
  0xdd   :  { %v377_v43 = vadd.f32 %v376_v62, %v375_v25  ;;  %v296_v44 = vrot.slane %v6705_v0, 4  ;;  %v6708_v59 = vcombine.high %v6706_v31, %v6707_v60  ;;  %v6711_v2 = vcombine.high %v6709_v47, %v6710_v7  ;;  %v6718_v18 = vld [vmem:[#allocation21_spill] sm:$0xff]  ;;  %v765_v20 = vld [vmem:[%s6542_s2 + $0x628] sm:$0xff] }
  0xde   :  { %3197 = vmatpush1.bf16.msra.mxu0 %v6703_v57  ;;  %3389 = vmatpush1.bf16.msra.mxu1 %v6704_v37  ;;  %v1970_v10 = vsel %vm1954_vm6, %v602_v14, %v1969_v17  ;;  %v413_v45 = vadd.f32 %v412_v48, %v411_v8  ;;  %v447_v36 = vadd.f32 %v446_v26, %v5233_v53  ;;  %v224_v50 = vrot.slane %v6712_v28, 4 }
  0xdf   :  { %3199 = vmatprep.subr.bf16.mxu0 %v6708_v59  ;;  %3391 = vmatprep.subr.bf16.mxu1 %v6711_v2  ;;  %v5461_v40 = vsel %vm1956_vm7, %v609_v9, %v1970_v10  ;;  %v378_v51 = vrot.slane %v377_v43, 1  ;;  %v563_v25 = vmul.f32 %v5255_v21, %v199_v54  ;;  %v570_v62 = vmul.f32 %v5248_v11, %v235_v61  ;;  %v762_v61 = vld [vmem:[%s6542_s2 + $0x608] sm:$0xff] }
  0xe0   :  { %v414_v24 = vrot.slane %v413_v45, 1  ;;  %v448_v52 = vrot.slane %v447_v36, 2  ;;  %v577_v6 = vmul.f32 %v5259_v29, %v271_v19  ;;  %v584_v58 = vmul.f32 %v5267_v13, %v307_v15  ;;  %v6722_v19 = vld [vmem:[#allocation37_spill] sm:$0xff] }
  0xe1   :  { %v6713_v8 = vcombine.low %v6706_v31, %v6707_v60  ;;  %v6714_v53 = vcombine.low %v6709_v47, %v6710_v7  ;;  %v379_v26 = vadd.f32 %v378_v51, %v377_v43  ;;  %v591_v5 = vmul.f32 %v5276_v56, %v343_v38  ;;  %v6728_v47 = vld [vmem:[#allocation26_spill] sm:$0xff]  ;;  %v6729_v7 = vld [vmem:[#allocation27_spill] sm:$0xff] }
  0xe2   :  { %v1986_v42 = vsel %vm1944_vm1, %v570_v62, %v563_v25  ;;  %v6717_v49 = vcombine.high %v6715_v22, %v6716_v16  ;;  %v6720_v23 = vcombine.high %v6718_v18, %v6719_v30  ;;  %v415_v34 = vadd.f32 %v414_v24, %v413_v45  ;;  %v770_v25 = vld [vmem:[%s6542_s2 + $0x660] sm:$0xff]  ;;  %v768_v62 = vld [vmem:[%s6542_s2 + $0x648] sm:$0xff] }
  0xe3   :  { %3201 = vmatpush1.bf16.msra.mxu0 %v6713_v8  ;;  %3393 = vmatpush1.bf16.msra.mxu1 %v6714_v53  ;;  %v449_v35 = vadd.f32 %v448_v52, %v447_v36  ;;  %v1987_v48 = vsel %vm1946_vm2, %v577_v6, %v1986_v42  ;;  %v368_v3 = vrot.slane %v6721_v27, 4  ;;  %v332_v54 = vrot.slane %v6722_v19, 4  ;;  %v771_v24 = vld [vmem:[%s6542_s2 + $0x668] sm:$0xff]  ;;  %v6731_v52 = vld [vmem:[#allocation30_spill] sm:$0xff]  ;;  %v6735_v42 = vld [vmem:[#allocation28_spill] sm:$0xff] }
  0xe4   :  { %3203 = vmatprep.subr.bf16.mxu0 %v6717_v49  ;;  %3395 = vmatprep.subr.bf16.mxu1 %v6720_v23  ;;  %v598_v14 = vmul.f32 %v5270_v32, %v379_v26  ;;  %v1988_v9 = vsel %vm1948_vm3, %v584_v58, %v1987_v48  ;;  %v189_v4 = vadd.f32 %v188_v1, %v6702_v33  ;;  %v6725_v33 = vld [vmem:[#allocation23_spill] sm:$0xff]  ;;  %v6726_v1 = vld [vmem:[#allocation24_spill] sm:$0xff]  ;;  %v262_v6 = vrot.slane %v6731_v52, 2  ;;  %v773_v23 = vld [vmem:[%s6542_s2 + $0x680] sm:$0xff] }
  0xe5   :  { %v450_v15 = vrot.slane %v449_v35, 1  ;;  %v605_v57 = vmul.f32 %v5287_v55, %v415_v34  ;;  %v1989_v37 = vsel %vm1950_vm4, %v591_v5, %v1988_v9  ;;  %v297_v17 = vadd.f32 %v296_v44, %v6705_v0  ;;  %v767_v44 = vld [vmem:[%s6542_s2 + $0x640] sm:$0xff]  ;;  %v6734_v5 = vld [vmem:[#allocation29_spill] sm:$0xff] }
  0xe6   :  { %v225_v38 = vadd.f32 %v224_v50, %v6712_v28  ;;  %v6723_v43 = vcombine.low %v6715_v22, %v6716_v16  ;;  %v6724_v31 = vcombine.low %v6718_v18, %v6719_v30  ;;  %v1990_v60 = vsel %vm1952_vm5, %v598_v14, %v1989_v37  ;;  %v776_v34 = vld [vmem:[%s6542_s2 + $0x6a0] sm:$0xff] }
  0xe7   :  { %v6727_v59 = vcombine.high %v6725_v33, %v6726_v1  ;;  %v6730_v2 = vcombine.high %v6728_v47, %v6729_v7  ;;  %v4106_v0 = vcombine.high %v762_v61, %v765_v20  ;;  %v451_v10 = vadd.f32 %v450_v15, %v449_v35 }
  0xe8   :  { %3205 = vmatpush1.bf16.msra.mxu0 %v6723_v43  ;;  %3397 = vmatpush1.bf16.msra.mxu1 %v6724_v31  ;;  %v1991_v45 = vsel %vm1954_vm6, %v605_v57, %v1990_v60  ;;  %v369_v36 = vadd.f32 %v368_v3, %v6721_v27  ;;  %v333_v51 = vadd.f32 %v332_v54, %v6722_v19  ;;  %v190_v58 = vrot.slane %v189_v4, 2  ;;  %v6737_v3 = vld [vmem:[#allocation39_spill] sm:$0xff] }
  0xe9   :  { %3207 = vmatprep.subr.bf16.mxu0 %v6727_v59  ;;  %3399 = vmatprep.subr.bf16.mxu1 %v6730_v2  ;;  %v612_v28 = vmul.f32 %v5281_v41, %v451_v10  ;;  %v298_v50 = vrot.slane %v297_v17, 2  ;;  %v226_v8 = vrot.slane %v225_v38, 2  ;;  %v6732_v53 = vcombine.low %v6725_v33, %v6726_v1  ;;  %v779_v33 = vld [vmem:[%s6542_s2 + $0x6c0] sm:$0xff] }
  0xea   :  { %v6733_v26 = vcombine.low %v6728_v47, %v6729_v7  ;;  %v4011_v22 = vcombine.low %v6735_v42, %v6734_v5  ;;  %v4107_v16 = vcombine.low %v762_v61, %v765_v20  ;;  %v6736_v49 = vcombine.high %v6735_v42, %v6734_v5  ;;  %v774_v61 = vld [vmem:[%s6542_s2 + $0x688] sm:$0xff] }
  0xeb   :  { %v4012_v18 = vcombine.high %v767_v44, %v770_v25  ;;  %v4108_v30 = vcombine.high %v768_v62, %v771_v24  ;;  %v5546_v35 = vsel %vm1956_vm7, %v612_v28, %v1991_v45  ;;  %v370_v48 = vrot.slane %v369_v36, 2  ;;  %v777_v20 = vld [vmem:[%s6542_s2 + $0x6a8] sm:$0xff] }
  0xec   :  { %3209 = vmatpush1.bf16.msra.mxu0 %v6732_v53  ;;  %3401 = vmatpush1.bf16.msra.mxu1 %v6733_v26  ;;  %v334_v27 = vrot.slane %v333_v51, 2  ;;  %v404_v19 = vrot.slane %v6737_v3, 4  ;;  %v440_v54 = vrot.slane %v5231_v39, 4  ;;  %v263_v14 = vadd.f32 %v262_v6, %v6731_v52  ;;  %v783_v7 = vld [vmem:[%s6542_s2 + $0x6e8] sm:$0xff] }
  0xed   :  { %3211 = vmatprep.subr.bf16.mxu0 %v6736_v49  ;;  %3403 = vmatprep.subr.bf16.mxu1 %v4106_v0  ;;  %v191_v9 = vadd.f32 %v190_v58, %v189_v4  ;;  %v4013_v15 = vcombine.low %v767_v44, %v770_v25  ;;  %v299_v57 = vadd.f32 %v298_v50, %v297_v17  ;;  %v782_v17 = vld [vmem:[%s6542_s2 + $0x6e0] sm:$0xff]  ;;  %v786_v6 = vld [vmem:[%s6542_s2 + $0x708] sm:$0xff] }
  0xee   :  { %v227_v37 = vadd.f32 %v226_v8, %v225_v38  ;;  %v4109_v43 = vcombine.low %v768_v62, %v771_v24  ;;  %v4014_v31 = vcombine.high %v773_v23, %v776_v34  ;;  %v4110_v60 = vcombine.high %v774_v61, %v777_v20  ;;  %v780_v38 = vld [vmem:[%s6542_s2 + $0x6c8] sm:$0xff]  ;;  %v785_v25 = vld [vmem:[%s6542_s2 + $0x700] sm:$0xff] }
  0xef   :  { %v371_v1 = vadd.f32 %v370_v48, %v369_v36  ;;  %v335_v59 = vadd.f32 %v334_v27, %v333_v51  ;;  %v405_v47 = vadd.f32 %v404_v19, %v6737_v3  ;;  %v441_v4 = vadd.f32 %v440_v54, %v5231_v39  ;;  %v788_v62 = vld [vmem:[%s6542_s2 + $0x720] sm:$0xff]  ;;  %v789_v58 = vld [vmem:[%s6542_s2 + $0x728] sm:$0xff] }
  0xf0   :  { %3213 = vmatpush1.bf16.msra.mxu0 %v4011_v22  ;;  %3405 = vmatpush1.bf16.msra.mxu1 %v4107_v16  ;;  %v264_v2 = vrot.slane %v263_v14, 1  ;;  %v192_v0 = vrot.slane %v191_v9, 1  ;;  %v300_v44 = vrot.slane %v299_v57, 1  ;;  %v228_v10 = vrot.slane %v227_v37, 1  ;;  %v792_v48 = vld [vmem:[%s6542_s2 + $0x748] sm:$0xff] }
  0xf1   :  { %3215 = vmatprep.subr.bf16.mxu0 %v4012_v18  ;;  %3407 = vmatprep.subr.bf16.mxu1 %v4108_v30  ;;  %v4015_v45 = vcombine.low %v773_v23, %v776_v34  ;;  %v4111_v39 = vcombine.low %v774_v61, %v777_v20  ;;  %v4016_v36 = vcombine.high %v779_v33, %v782_v17  ;;  %v336_v24 = vrot.slane %v335_v59, 1  ;;  %v791_v23 = vld [vmem:[%s6542_s2 + $0x740] sm:$0xff]  ;;  %v795_v27 = vld [vmem:[%s6542_s2 + $0x768] sm:$0xff] }
  0xf2   :  { %v4112_v51 = vcombine.high %v780_v38, %v783_v7  ;;  %v406_v52 = vrot.slane %v405_v47, 2  ;;  %v372_v28 = vrot.slane %v371_v1, 1  ;;  %v442_v50 = vrot.slane %v441_v4, 2  ;;  %v794_v34 = vld [vmem:[%s6542_s2 + $0x760] sm:$0xff] }
  0xf3   :  { %v265_v8 = vadd.f32 %v264_v2, %v263_v14  ;;  %v193_v53 = vadd.f32 %v192_v0, %v191_v9  ;;  %v4017_v26 = vcombine.low %v779_v33, %v782_v17  ;;  %v4113_v5 = vcombine.low %v780_v38, %v783_v7 }
  0xf4   :  { %3217 = vmatpush1.bf16.msra.mxu0 %v4013_v15  ;;  %3409 = vmatpush1.bf16.msra.mxu1 %v4109_v43  ;;  %v301_v42 = vadd.f32 %v300_v44, %v299_v57  ;;  %v229_v22 = vadd.f32 %v228_v10, %v227_v37  ;;  %v4018_v16 = vcombine.high %v785_v25, %v788_v62  ;;  %v803_v10 = vld [vmem:[%s6542_s2 + $0x7c0] sm:$0xff] }
  0xf5   :  { %3219 = vmatprep.subr.bf16.mxu0 %v4014_v31  ;;  %3411 = vmatprep.subr.bf16.mxu1 %v4110_v60  ;;  %v4019_v49 = vcombine.low %v785_v25, %v788_v62  ;;  %v4114_v18 = vcombine.high %v786_v6, %v789_v58  ;;  %v4115_v30 = vcombine.low %v786_v6, %v789_v58  ;;  %v809_v6 = vld [vmem:[%s6542_s2 + $0x800] sm:$0xff] }
  0xf6   :  { %v337_v3 = vadd.f32 %v336_v24, %v335_v59  ;;  %v373_v19 = vadd.f32 %v372_v28, %v371_v1  ;;  %v407_v54 = vadd.f32 %v406_v52, %v405_v47  ;;  %v443_v61 = vadd.f32 %v442_v50, %v441_v4  ;;  %v812_v58 = vld [vmem:[%s6542_s2 + $0x820] sm:$0xff]  ;;  %v810_v28 = vld [vmem:[%s6542_s2 + $0x808] sm:$0xff] }
  0xf7   :  { %v562_v20 = vmul.f32 %v5255_v21, %v193_v53  ;;  %v569_v14 = vmul.f32 %v5248_v11, %v229_v22  ;;  %v576_v9 = vmul.f32 %v5259_v29, %v265_v8  ;;  %v583_v15 = vmul.f32 %v5267_v13, %v301_v42  ;;  %v797_v11 = vld [vmem:[%s6542_s2 + $0x780] sm:$0xff]  ;;  %v798_v13 = vld [vmem:[%s6542_s2 + $0x788] sm:$0xff] }
  0xf8   :  { %3221 = vmatpush1.bf16.msra.mxu0 %v4015_v45  ;;  %3413 = vmatpush1.bf16.msra.mxu1 %v4111_v39  ;;  %v408_v57 = vrot.slane %v407_v54, 1  ;;  %v444_v37 = vrot.slane %v443_v61, 1  ;;  %v590_v43 = vmul.f32 %v5276_v56, %v337_v3  ;;  %v597_v31 = vmul.f32 %v5270_v32, %v373_v19  ;;  %v800_v29 = vld [vmem:[%s6542_s2 + $0x7a0] sm:$0xff]  ;;  %v801_v32 = vld [vmem:[%s6542_s2 + $0x7a8] sm:$0xff] }
  0xf9   :  { %3223 = vmatprep.subr.bf16.mxu0 %v4016_v36  ;;  %3415 = vmatprep.subr.bf16.mxu1 %v4112_v51  ;;  %v4020_v60 = vcombine.high %v791_v23, %v794_v34  ;;  %v4116_v33 = vcombine.high %v792_v48, %v795_v27  ;;  %v1979_v21 = vsel %vm1944_vm1, %v569_v14, %v562_v20  ;;  %v806_v39 = vld [vmem:[%s6542_s2 + $0x7e0] sm:$0xff]  ;;  %v813_v50 = vld [vmem:[%s6542_s2 + $0x828] sm:$0xff] }
  0xfa   :  { %v409_v56 = vadd.f32 %v408_v57, %v407_v54  ;;  %v445_v1 = vadd.f32 %v444_v37, %v443_v61  ;;  %v1980_v59 = vsel %vm1946_vm2, %v576_v9, %v1979_v21  ;;  %v4021_v47 = vcombine.low %v791_v23, %v794_v34  ;;  %v815_v42 = vld [vmem:[%s6542_s2 + $0x840] sm:$0xff]  ;;  %v822_v3 = vld [vmem:[%s6542_s2 + $0x888] sm:$0xff] }
  0xfb   :  { %v4117_v4 = vcombine.low %v792_v48, %v795_v27  ;;  %v1981_v17 = vsel %vm1948_vm3, %v583_v15, %v1980_v59  ;;  %v4022_v0 = vcombine.high %v797_v11, %v800_v29  ;;  %v4118_v44 = vcombine.high %v798_v13, %v801_v32  ;;  %v818_v22 = vld [vmem:[%s6542_s2 + $0x860] sm:$0xff]  ;;  %v825_v19 = vld [vmem:[%s6542_s2 + $0x8a8] sm:$0xff] }
  0xfc   :  { %3225 = vmatpush1.bf16.msra.mxu0 %v4017_v26  ;;  %3417 = vmatpush1.bf16.msra.mxu1 %v4113_v5  ;;  %v604_v38 = vmul.f32 %v5287_v55, %v409_v56  ;;  %v611_v7 = vmul.f32 %v5281_v41, %v445_v1  ;;  %v1982_v2 = vsel %vm1950_vm4, %v590_v43, %v1981_v17  ;;  %v804_v41 = vld [vmem:[%s6542_s2 + $0x7c8] sm:$0xff]  ;;  %v821_v48 = vld [vmem:[%s6542_s2 + $0x880] sm:$0xff] }
  0xfd   :  { %3227 = vmatprep.subr.bf16.mxu0 %v4018_v16  ;;  %3419 = vmatprep.subr.bf16.mxu1 %v4114_v18  ;;  %v1983_v45 = vsel %vm1952_vm5, %v597_v31, %v1982_v2  ;;  %v807_v55 = vld [vmem:[%s6542_s2 + $0x7e8] sm:$0xff]  ;;  %v4023_v25 = vcombine.low %v797_v11, %v800_v29  ;;  %v4119_v62 = vcombine.low %v798_v13, %v801_v32  ;;  %v824_v27 = vld [vmem:[%s6542_s2 + $0x8a0] sm:$0xff] }
  0xfe   :  { %v1984_v36 = vsel %vm1954_vm6, %v604_v38, %v1983_v45  ;;  %v4024_v24 = vcombine.high %v803_v10, %v806_v39  ;;  %v4120_v52 = vcombine.high %v804_v41, %v807_v55  ;;  %v4025_v8 = vcombine.low %v803_v10, %v806_v39  ;;  %v816_v16 = vld [vmem:[%s6542_s2 + $0x848] sm:$0xff]  ;;  %v827_v9 = vld [vmem:[%s6542_s2 + $0x8c0] sm:$0xff] }
  0xff   :  { %v5634_v51 = vsel %vm1956_vm7, %v611_v7, %v1984_v36  ;;  %v4121_v53 = vcombine.low %v804_v41, %v807_v55  ;;  %v4026_v26 = vcombine.high %v809_v6, %v812_v58  ;;  %v4122_v5 = vcombine.high %v810_v28, %v813_v50  ;;  %v830_v15 = vld [vmem:[%s6542_s2 + $0x8e0] sm:$0xff]  ;;  %v828_v57 = vld [vmem:[%s6542_s2 + $0x8c8] sm:$0xff] }
 0x100   :  { %3229 = vmatpush1.bf16.msra.mxu0 %v4019_v49  ;;  %3421 = vmatpush1.bf16.msra.mxu1 %v4115_v30  ;;  %v819_v49 = vld [vmem:[%s6542_s2 + $0x868] sm:$0xff]  ;;  %v4027_v18 = vcombine.low %v809_v6, %v812_v58  ;;  %v4123_v30 = vcombine.low %v810_v28, %v813_v50  ;;  %v4028_v23 = vcombine.high %v815_v42, %v818_v22  ;;  %v833_v11 = vld [vmem:[%s6542_s2 + $0x900] sm:$0xff] }
 0x101   :  { %3231 = vmatprep.subr.bf16.mxu0 %v4020_v60  ;;  %3423 = vmatprep.subr.bf16.mxu1 %v4116_v33  ;;  %v4124_v34 = vcombine.high %v816_v16, %v819_v49  ;;  %v4029_v54 = vcombine.low %v815_v42, %v818_v22  ;;  %v4125_v61 = vcombine.low %v816_v16, %v819_v49  ;;  %v831_v37 = vld [vmem:[%s6542_s2 + $0x8e8] sm:$0xff]  ;;  %v836_v21 = vld [vmem:[%s6542_s2 + $0x920] sm:$0xff] }
 0x102   :  { %v4030_v20 = vcombine.high %v821_v48, %v824_v27  ;;  %v4126_v14 = vcombine.high %v822_v3, %v825_v19  ;;  %v4031_v43 = vcombine.low %v821_v48, %v824_v27  ;;  %v4127_v31 = vcombine.low %v822_v3, %v825_v19  ;;  %v834_v29 = vld [vmem:[%s6542_s2 + $0x908] sm:$0xff]  ;;  %v845_v10 = vld [vmem:[%s6542_s2 + $0x980] sm:$0xff] }
 0x103   :  { %v4032_v60 = vcombine.high %v827_v9, %v830_v15  ;;  %v4128_v33 = vcombine.high %v828_v57, %v831_v37  ;;  %v837_v13 = vld [vmem:[%s6542_s2 + $0x928] sm:$0xff]  ;;  %v4033_v32 = vcombine.low %v827_v9, %v830_v15  ;;  %v4129_v56 = vcombine.low %v828_v57, %v831_v37  ;;  %v848_v45 = vld [vmem:[%s6542_s2 + $0x9a0] sm:$0xff] }
 0x104   :  { %3233 = vmatpush1.bf16.msra.mxu0 %v4021_v47  ;;  %3425 = vmatpush1.bf16.msra.mxu1 %v4117_v4  ;;  %v4034_v1 = vcombine.high %v833_v11, %v836_v21  ;;  %v4130_v59 = vcombine.high %v834_v29, %v837_v13  ;;  %v839_v47 = vld [vmem:[%s6542_s2 + $0x940] sm:$0xff]  ;;  %v840_v17 = vld [vmem:[%s6542_s2 + $0x948] sm:$0xff]  ;;  %v4035_v7 = vcombine.low %v833_v11, %v836_v21 }
 0x105   :  { %3235 = vmatprep.subr.bf16.mxu0 %v4022_v0  ;;  %3427 = vmatprep.subr.bf16.mxu1 %v4118_v44  ;;  %v842_v4 = vld [vmem:[%s6542_s2 + $0x960] sm:$0xff]  ;;  %v843_v38 = vld [vmem:[%s6542_s2 + $0x968] sm:$0xff]  ;;  %v4131_v2 = vcombine.low %v834_v29, %v837_v13  ;;  %v4039_v28 = vcombine.low %v845_v10, %v848_v45 }
 0x106   :  { %v4036_v0 = vcombine.high %v839_v47, %v842_v4  ;;  %v4132_v44 = vcombine.high %v840_v17, %v843_v38  ;;  %v846_v39 = vld [vmem:[%s6542_s2 + $0x988] sm:$0xff]  ;;  %v4037_v55 = vcombine.low %v839_v47, %v842_v4  ;;  %v4133_v36 = vcombine.low %v840_v17, %v843_v38 }
 0x107   :  { %v849_v41 = vld [vmem:[%s6542_s2 + $0x9a8] sm:$0xff] }
 0x108   :  { %3237 = vmatpush1.bf16.msra.mxu0 %v4023_v25  ;;  %3429 = vmatpush1.bf16.msra.mxu1 %v4119_v62  ;;  %v4038_v25 = vcombine.high %v845_v10, %v848_v45  ;;  %v4134_v62 = vcombine.high %v846_v39, %v849_v41  ;;  %v852_v6 = vld [vmem:[%s6542_s2 + $0x9c8] sm:$0xff]  ;;  %v4135_v50 = vcombine.low %v846_v39, %v849_v41 }
 0x109   :  { %3239 = vmatprep.subr.bf16.mxu0 %v4024_v24  ;;  %3431 = vmatprep.subr.bf16.mxu1 %v4120_v52  ;;  %v851_v24 = vld [vmem:[%s6542_s2 + $0x9c0] sm:$0xff]  ;;  %v855_v58 = vld [vmem:[%s6542_s2 + $0x9e8] sm:$0xff] }
 0x10a   :  { %v854_v52 = vld [vmem:[%s6542_s2 + $0x9e0] sm:$0xff]  ;;  %v858_v42 = vld [vmem:[%s6542_s2 + $0xa08] sm:$0xff]  ;;  %v4137_v49 = vcombine.low %v852_v6, %v855_v58 }
 0x10b   :  { %v861_v22 = vld [vmem:[%s6542_s2 + $0xa28] sm:$0xff]  ;;  %v4041_v16 = vcombine.low %v851_v24, %v854_v52 }
 0x10c   :  { %3241 = vmatpush1.bf16.msra.mxu0 %v4025_v8  ;;  %3433 = vmatpush1.bf16.msra.mxu1 %v4121_v53  ;;  %v4040_v8 = vcombine.high %v851_v24, %v854_v52  ;;  %v4136_v53 = vcombine.high %v852_v6, %v855_v58  ;;  %v864_v48 = vld [vmem:[%s6542_s2 + $0xa48] sm:$0xff]  ;;  %v4139_v19 = vcombine.low %v858_v42, %v861_v22 }
 0x10d   :  { %3243 = vmatprep.subr.bf16.mxu0 %v4026_v26  ;;  %3435 = vmatprep.subr.bf16.mxu1 %v4122_v5  ;;  %v857_v26 = vld [vmem:[%s6542_s2 + $0xa00] sm:$0xff]  ;;  %v867_v27 = vld [vmem:[%s6542_s2 + $0xa68] sm:$0xff] }
 0x10e   :  { %v860_v5 = vld [vmem:[%s6542_s2 + $0xa20] sm:$0xff]  ;;  %v870_v9 = vld [vmem:[%s6542_s2 + $0xa88] sm:$0xff]  ;;  %v4141_v37 = vcombine.low %v864_v48, %v867_v27 }
 0x10f   :  { %2135 = vmatmul.mubr.f32.vlgmr.msra.gmra.mrb[0].mxu0 %v5461_v40  ;;  %2348 = vmatmul.mubr.f32.vlgmr.msra.gmra.mrb[0].mxu1 %v5461_v40  ;;  %v4043_v3 = vcombine.low %v857_v26, %v860_v5  ;;  %v873_v15 = vld [vmem:[%s6542_s2 + $0xaa8] sm:$0xff] }
 0x110   :  { %3245 = vmatpush1.bf16.msra.mxu0 %v4027_v18  ;;  %2205 = vmatprep.mubr.f32.mxu0 %v5546_v35  ;;  %v4042_v18 = vcombine.high %v857_v26, %v860_v5  ;;  %v876_v11 = vld [vmem:[%s6542_s2 + $0xac8] sm:$0xff]  ;;  %v4143_v13 = vcombine.low %v870_v9, %v873_v15 }
 0x111   :  { %3437 = vmatpush1.bf16.msra.mxu1 %v4123_v30  ;;  %2418 = vmatprep.mubr.f32.mxu1 %v5546_v35  ;;  %v4138_v30 = vcombine.high %v858_v42, %v861_v22  ;;  %v879_v21 = vld [vmem:[%s6542_s2 + $0xae8] sm:$0xff] }
 0x112   :  { %3247 = vmatprep.subr.bf16.mxu0 %v4028_v23  ;;  %3439 = vmatprep.subr.bf16.mxu1 %v4124_v34  ;;  %v863_v23 = vld [vmem:[%s6542_s2 + $0xa40] sm:$0xff]  ;;  %v882_v47 = vld [vmem:[%s6542_s2 + $0xb08] sm:$0xff]  ;;  %v4145_v38 = vcombine.low %v876_v11, %v879_v21 }
 0x113   :  { %v866_v34 = vld [vmem:[%s6542_s2 + $0xa60] sm:$0xff]  ;;  %v885_v4 = vld [vmem:[%s6542_s2 + $0xb28] sm:$0xff] }
 0x114   :  { %3249 = vmatpush1.bf16.msra.mxu0 %v4029_v54  ;;  %v4044_v54 = vcombine.high %v863_v23, %v866_v34  ;;  %v4045_v57 = vcombine.low %v863_v23, %v866_v34  ;;  %v888_v10 = vld [vmem:[%s6542_s2 + $0xb48] sm:$0xff]  ;;  %v4147_v41 = vcombine.low %v882_v47, %v885_v4 }
 0x115   :  { %3441 = vmatpush1.bf16.msra.mxu1 %v4125_v61  ;;  %3251 = vmatprep.subr.bf16.mxu0 %v4030_v20  ;;  %v4140_v61 = vcombine.high %v864_v48, %v867_v27  ;;  %v869_v20 = vld [vmem:[%s6542_s2 + $0xa80] sm:$0xff]  ;;  %v891_v45 = vld [vmem:[%s6542_s2 + $0xb68] sm:$0xff]  ;;  %v625_v27 = vld [vmem:[%s6542_s2 + $0x50] sm:$0xff] }
 0x116   :  { %3443 = vmatprep.subr.bf16.mxu1 %v4126_v14  ;;  %v872_v14 = vld [vmem:[%s6542_s2 + $0xaa0] sm:$0xff]  ;;  %v894_v24 = vld [vmem:[%s6542_s2 + $0xb88] sm:$0xff]  ;;  %v4149_v58 = vcombine.low %v888_v10, %v891_v45 }
 0x117   :  { %v4047_v29 = vcombine.low %v869_v20, %v872_v14  ;;  %v897_v52 = vld [vmem:[%s6542_s2 + $0xba8] sm:$0xff] }
 0x118   :  { %3253 = vmatpush1.bf16.msra.mxu0 %v4031_v43  ;;  %v4046_v43 = vcombine.high %v869_v20, %v872_v14  ;;  %v900_v26 = vld [vmem:[%s6542_s2 + $0xbc8] sm:$0xff]  ;;  %v4151_v22 = vcombine.low %v894_v24, %v897_v52  ;;  %v634_v20 = vld [vmem:[%s6542_s2 + $0xb0] sm:$0xff] }
 0x119   :  { %3445 = vmatpush1.bf16.msra.mxu1 %v4127_v31  ;;  %3255 = vmatprep.subr.bf16.mxu0 %v4032_v60  ;;  %v4142_v31 = vcombine.high %v870_v9, %v873_v15  ;;  %v875_v60 = vld [vmem:[%s6542_s2 + $0xac0] sm:$0xff]  ;;  %v903_v5 = vld [vmem:[%s6542_s2 + $0xbe8] sm:$0xff]  ;;  %v637_v15 = vld [vmem:[%s6542_s2 + $0xd0] sm:$0xff] }
 0x11a   :  { %3447 = vmatprep.subr.bf16.mxu1 %v4128_v33  ;;  %v878_v33 = vld [vmem:[%s6542_s2 + $0xae0] sm:$0xff]  ;;  %v4153_v34 = vcombine.low %v900_v26, %v903_v5 }
 0x11b   :  { %v4049_v17 = vcombine.low %v875_v60, %v878_v33 }
 0x11c   :  { %3257 = vmatpush1.bf16.msra.mxu0 %v4033_v32  ;;  %v4048_v32 = vcombine.high %v875_v60, %v878_v33 }
 0x11d   :  { %3449 = vmatpush1.bf16.msra.mxu1 %v4129_v56  ;;  %3259 = vmatprep.subr.bf16.mxu0 %v4034_v1  ;;  %v4144_v56 = vcombine.high %v876_v11, %v879_v21  ;;  %v881_v1 = vld [vmem:[%s6542_s2 + $0xb00] sm:$0xff]  ;;  %v649_v11 = vld [vmem:[%s6542_s2 + $0x150] sm:$0xff] }
 0x11e   :  { %3451 = vmatprep.subr.bf16.mxu1 %v4130_v59  ;;  %v884_v59 = vld [vmem:[%s6542_s2 + $0xb20] sm:$0xff]  ;;  %v652_v21 = vld [vmem:[%s6542_s2 + $0x170] sm:$0xff] }
 0x11f   :  { %v4051_v39 = vcombine.low %v881_v1, %v884_v59 }
 0x120   :  { %3261 = vmatpush1.bf16.msra.mxu0 %v4035_v7  ;;  %v4050_v7 = vcombine.high %v881_v1, %v884_v59  ;;  %v4165_v1 = vcombine.low %v649_v11, %v652_v21 }
 0x121   :  { %3453 = vmatpush1.bf16.msra.mxu1 %v4131_v2  ;;  %3263 = vmatprep.subr.bf16.mxu0 %v4036_v0  ;;  %v4146_v2 = vcombine.high %v882_v47, %v885_v4  ;;  %v887_v0 = vld [vmem:[%s6542_s2 + $0xb40] sm:$0xff]  ;;  %v661_v47 = vld [vmem:[%s6542_s2 + $0x1d0] sm:$0xff] }
 0x122   :  { %3455 = vmatprep.subr.bf16.mxu1 %v4132_v44  ;;  %v890_v44 = vld [vmem:[%s6542_s2 + $0xb60] sm:$0xff]  ;;  %v664_v4 = vld [vmem:[%s6542_s2 + $0x1f0] sm:$0xff] }
 0x123   :  { %v4053_v6 = vcombine.low %v887_v0, %v890_v44 }
 0x124   :  { %3265 = vmatpush1.bf16.msra.mxu0 %v4037_v55  ;;  %v4052_v55 = vcombine.high %v887_v0, %v890_v44  ;;  %v4169_v0 = vcombine.low %v661_v47, %v664_v4 }
 0x125   :  { %3457 = vmatpush1.bf16.msra.mxu1 %v4133_v36  ;;  %3267 = vmatprep.subr.bf16.mxu0 %v4038_v25  ;;  %v4148_v36 = vcombine.high %v888_v10, %v891_v45  ;;  %v893_v25 = vld [vmem:[%s6542_s2 + $0xb80] sm:$0xff]  ;;  %v673_v10 = vld [vmem:[%s6542_s2 + $0x250] sm:$0xff] }
 0x126   :  { %3459 = vmatprep.subr.bf16.mxu1 %v4134_v62  ;;  %v896_v62 = vld [vmem:[%s6542_s2 + $0xba0] sm:$0xff]  ;;  %v676_v45 = vld [vmem:[%s6542_s2 + $0x270] sm:$0xff] }
 0x127   :  { %v4055_v42 = vcombine.low %v893_v25, %v896_v62 }
 0x128   :  { %3269 = vmatpush1.bf16.msra.mxu0 %v4039_v28  ;;  %v4054_v28 = vcombine.high %v893_v25, %v896_v62  ;;  %v4173_v25 = vcombine.low %v673_v10, %v676_v45  ;;  %v1481_v62 = vld [vmem:[%s6542_s2 + $0x18] sm:$0xff] }
 0x129   :  { %3461 = vmatpush1.bf16.msra.mxu1 %v4135_v50  ;;  %3271 = vmatprep.subr.bf16.mxu0 %v4040_v8  ;;  %v4150_v50 = vcombine.high %v894_v24, %v897_v52  ;;  %v899_v8 = vld [vmem:[%s6542_s2 + $0xbc0] sm:$0xff]  ;;  %v1482_v24 = vld [vmem:[%s6542_s2 + $0x38] sm:$0xff] }
 0x12a   :  { %3463 = vmatprep.subr.bf16.mxu1 %v4136_v53  ;;  %v902_v53 = vld [vmem:[%s6542_s2 + $0xbe0] sm:$0xff] }
 0x12b   :  { %v4057_v23 = vcombine.low %v899_v8, %v902_v53 }
 0x12c   :  { %3273 = vmatpush1.bf16.msra.mxu0 %v4041_v16  ;;  %v4056_v16 = vcombine.high %v899_v8, %v902_v53  ;;  %v1483_v53 = vld [vmem:[%s6542_s2 + $0x58] sm:$0xff] }
 0x12d   :  { %3465 = vmatpush1.bf16.msra.mxu1 %v4137_v49  ;;  %3275 = vmatprep.subr.bf16.mxu0 %v4042_v18  ;;  %v4152_v49 = vcombine.high %v900_v26, %v903_v5  ;;  %v619_v18 = vld [vmem:[%s6542_s2 + $0x10] sm:$0xff]  ;;  %v1484_v26 = vld [vmem:[%s6542_s2 + $0x78] sm:$0xff] }
 0x12e   :  { %3467 = vmatprep.subr.bf16.mxu1 %v4138_v30  ;;  %v622_v30 = vld [vmem:[%s6542_s2 + $0x30] sm:$0xff] }
 0x12f   :  { %v4154_v48 = vcombine.high %v619_v18, %v622_v30 }
 0x130   :  { %3277 = vmatpush1.bf16.msra.mxu0 %v4043_v3  ;;  %v628_v3 = vld [vmem:[%s6542_s2 + $0x70] sm:$0xff] }
 0x131   :  { %3469 = vmatpush1.bf16.msra.mxu1 %v4139_v19  ;;  %3279 = vmatprep.subr.bf16.mxu0 %v4044_v54  ;;  %v4155_v19 = vcombine.low %v619_v18, %v622_v30  ;;  %v4156_v54 = vcombine.high %v625_v27, %v628_v3  ;;  %v4157_v14 = vcombine.low %v625_v27, %v628_v3  ;;  %v1485_v30 = vld [vmem:[%s6542_s2 + $0x98] sm:$0xff]  ;;  %v697_v3 = vld [vmem:[%s6542_s2 + $0x350] sm:$0xff] }
 0x132   :  { %3471 = vmatprep.subr.bf16.mxu1 %v4140_v61  ;;  %v631_v61 = vld [vmem:[%s6542_s2 + $0x90] sm:$0xff] }
 0x133   :  { %v4158_v9 = vcombine.high %v631_v61, %v634_v20 }
 0x134   :  { %3281 = vmatpush1.bf16.msra.mxu0 %v4045_v57  ;;  %v640_v57 = vld [vmem:[%s6542_s2 + $0xf0] sm:$0xff] }
 0x135   :  { %3473 = vmatpush1.bf16.msra.mxu1 %v4141_v37  ;;  %3283 = vmatprep.subr.bf16.mxu0 %v4046_v43  ;;  %v4159_v37 = vcombine.low %v631_v61, %v634_v20  ;;  %v4160_v43 = vcombine.high %v637_v15, %v640_v57  ;;  %v4161_v60 = vcombine.low %v637_v15, %v640_v57  ;;  %v1487_v61 = vld [vmem:[%s6542_s2 + $0xd8] sm:$0xff]  ;;  %v703_v57 = vld [vmem:[%s6542_s2 + $0x390] sm:$0xff] }
 0x136   :  { %3475 = vmatprep.subr.bf16.mxu1 %v4142_v31  ;;  %v643_v31 = vld [vmem:[%s6542_s2 + $0x110] sm:$0xff]  ;;  %v1488_v20 = vld [vmem:[%s6542_s2 + $0xf8] sm:$0xff] }
 0x137   :  { %v4257_v15 = vcombine.low %v1487_v61, %v1488_v20 }
 0x138   :  { %3285 = vmatpush1.bf16.msra.mxu0 %v4047_v29 }
 0x139   :  { %3477 = vmatpush1.bf16.msra.mxu1 %v4143_v13  ;;  %3287 = vmatprep.subr.bf16.mxu0 %v4048_v32  ;;  %v4164_v13 = vcombine.high %v649_v11, %v652_v21  ;;  %v655_v32 = vld [vmem:[%s6542_s2 + $0x190] sm:$0xff] }
 0x13a   :  { %3479 = vmatprep.subr.bf16.mxu1 %v4144_v56  ;;  %v658_v56 = vld [vmem:[%s6542_s2 + $0x1b0] sm:$0xff] }
 0x13b   :  { %v4166_v59 = vcombine.high %v655_v32, %v658_v56  ;;  %v709_v21 = vld [vmem:[%s6542_s2 + $0x3d0] sm:$0xff] }
 0x13c   :  { %3289 = vmatpush1.bf16.msra.mxu0 %v4049_v17  ;;  %v4167_v17 = vcombine.low %v655_v32, %v658_v56  ;;  %v1491_v32 = vld [vmem:[%s6542_s2 + $0x158] sm:$0xff] }
 0x13d   :  { %3481 = vmatpush1.bf16.msra.mxu1 %v4145_v38  ;;  %3291 = vmatprep.subr.bf16.mxu0 %v4050_v7  ;;  %v4168_v38 = vcombine.high %v661_v47, %v664_v4  ;;  %v667_v7 = vld [vmem:[%s6542_s2 + $0x210] sm:$0xff]  ;;  %v1492_v56 = vld [vmem:[%s6542_s2 + $0x178] sm:$0xff] }
 0x13e   :  { %3483 = vmatprep.subr.bf16.mxu1 %v4146_v2  ;;  %v670_v2 = vld [vmem:[%s6542_s2 + $0x230] sm:$0xff]  ;;  %v4261_v47 = vcombine.low %v1491_v32, %v1492_v56 }
 0x13f   :  { %v4170_v44 = vcombine.high %v667_v7, %v670_v2  ;;  %v715_v4 = vld [vmem:[%s6542_s2 + $0x410] sm:$0xff] }
 0x140   :  { %3293 = vmatpush1.bf16.msra.mxu0 %v4051_v39  ;;  %v4171_v39 = vcombine.low %v667_v7, %v670_v2  ;;  %v1493_v7 = vld [vmem:[%s6542_s2 + $0x198] sm:$0xff] }
 0x141   :  { %3485 = vmatpush1.bf16.msra.mxu1 %v4147_v41  ;;  %3295 = vmatprep.subr.bf16.mxu0 %v4052_v55  ;;  %v4172_v41 = vcombine.high %v673_v10, %v676_v45  ;;  %v679_v55 = vld [vmem:[%s6542_s2 + $0x290] sm:$0xff]  ;;  %v1494_v2 = vld [vmem:[%s6542_s2 + $0x1b8] sm:$0xff] }
 0x142   :  { %3487 = vmatprep.subr.bf16.mxu1 %v4148_v36  ;;  %v682_v36 = vld [vmem:[%s6542_s2 + $0x2b0] sm:$0xff]  ;;  %v4263_v10 = vcombine.low %v1493_v7, %v1494_v2 }
 0x143   :  { %v4174_v52 = vcombine.high %v679_v55, %v682_v36  ;;  %v4175_v8 = vcombine.low %v679_v55, %v682_v36  ;;  %v721_v45 = vld [vmem:[%s6542_s2 + $0x450] sm:$0xff]  ;;  %v1495_v55 = vld [vmem:[%s6542_s2 + $0x1d8] sm:$0xff] }
 0x144   :  { %3297 = vmatpush1.bf16.msra.mxu0 %v4053_v6  ;;  %v4250_v6 = vcombine.high %v1481_v62, %v1482_v24  ;;  %v1496_v36 = vld [vmem:[%s6542_s2 + $0x1f8] sm:$0xff] }
 0x145   :  { %3489 = vmatpush1.bf16.msra.mxu1 %v4149_v58  ;;  %3299 = vmatprep.subr.bf16.mxu0 %v4054_v28  ;;  %v4251_v58 = vcombine.low %v1481_v62, %v1482_v24  ;;  %v685_v28 = vld [vmem:[%s6542_s2 + $0x2d0] sm:$0xff]  ;;  %v4264_v62 = vcombine.high %v1495_v55, %v1496_v36  ;;  %v4265_v24 = vcombine.low %v1495_v55, %v1496_v36  ;;  %v1511_v36 = vld [vmem:[%s6542_s2 + $0x3d8] sm:$0xff] }
 0x146   :  { %3491 = vmatprep.subr.bf16.mxu1 %v4150_v50  ;;  %v688_v50 = vld [vmem:[%s6542_s2 + $0x2f0] sm:$0xff] }
 0x147   :  { %v4176_v5 = vcombine.high %v685_v28, %v688_v50  ;;  %v4177_v18 = vcombine.low %v685_v28, %v688_v50  ;;  %v1498_v28 = vld [vmem:[%s6542_s2 + $0x238] sm:$0xff] }
 0x148   :  { %3301 = vmatpush1.bf16.msra.mxu0 %v4055_v42  ;;  %v4252_v42 = vcombine.high %v1483_v53, %v1484_v26  ;;  %v1499_v50 = vld [vmem:[%s6542_s2 + $0x258] sm:$0xff] }
 0x149   :  { %3493 = vmatpush1.bf16.msra.mxu1 %v4151_v22  ;;  %3303 = vmatprep.subr.bf16.mxu0 %v4056_v16  ;;  %v4253_v22 = vcombine.low %v1483_v53, %v1484_v26  ;;  %v691_v16 = vld [vmem:[%s6542_s2 + $0x310] sm:$0xff] }
 0x14a   :  { %3495 = vmatprep.subr.bf16.mxu1 %v4152_v49  ;;  %v694_v49 = vld [vmem:[%s6542_s2 + $0x330] sm:$0xff] }
 0x14c   :  { %3305 = vmatpush1.bf16.msra.mxu0 %v4057_v23  ;;  %v1486_v23 = vld [vmem:[%s6542_s2 + $0xb8] sm:$0xff] }
 0x14d   :  { %3497 = vmatpush1.bf16.msra.mxu1 %v4153_v34  ;;  %3499 = vmatprep.subr.bf16.mxu0 %v4154_v48  ;;  %v4178_v34 = vcombine.high %v691_v16, %v694_v49  ;;  %v4254_v48 = vcombine.high %v1485_v30, %v1486_v23  ;;  %v4255_v27 = vcombine.low %v1485_v30, %v1486_v23 }
 0x14e   :  { %3691 = vmatprep.subr.bf16.mxu1 %v4250_v6  ;;  %v730_v6 = vld [vmem:[%s6542_s2 + $0x4b0] sm:$0xff] }
 0x14f   :  { %2206 = vmatmul.mubr.f32.vlgmr.msra.gmra.mrb[0].mxu0 %v5634_v51 }
 0x150   :  { %2419 = vmatmul.mubr.f32.vlgmr.msra.gmra.mrb[0].mxu1 %v5634_v51  ;;  %3501 = vmatpush1.bf16.msra.mxu0 %v4155_v19  ;;  %v700_v19 = vld [vmem:[%s6542_s2 + $0x370] sm:$0xff] }
 0x151   :  { %2489 = vmatprep.mubr.f32.mxu0 %v5307_v63  ;;  %3503 = vmatprep.subr.bf16.mxu0 %v4156_v54  ;;  %v646_v63 = vld [vmem:[%s6542_s2 + $0x130] sm:$0xff]  ;;  %v4179_v54 = vcombine.low %v691_v16, %v694_v49  ;;  %v1501_v16 = vld [vmem:[%s6542_s2 + $0x298] sm:$0xff] }
 0x152   :  { %v4162_v33 = vcombine.high %v643_v31, %v646_v63  ;;  %v4163_v29 = vcombine.low %v643_v31, %v646_v63  ;;  %3693 = vmatpush1.bf16.msra.mxu1 %v4251_v58  ;;  %v1489_v31 = vld [vmem:[%s6542_s2 + $0x118] sm:$0xff] }
 0x153   :  { %3695 = vmatprep.subr.bf16.mxu1 %v4252_v42  ;;  %v1490_v63 = vld [vmem:[%s6542_s2 + $0x138] sm:$0xff]  ;;  %v733_v42 = vld [vmem:[%s6542_s2 + $0x4d0] sm:$0xff] }
 0x154   :  { %3505 = vmatpush1.bf16.msra.mxu0 %v4157_v14  ;;  %v4180_v14 = vcombine.high %v697_v3, %v700_v19  ;;  %v4259_v11 = vcombine.low %v1489_v31, %v1490_v63  ;;  %v1497_v58 = vld [vmem:[%s6542_s2 + $0x218] sm:$0xff] }
 0x155   :  { %3507 = vmatprep.subr.bf16.mxu0 %v4158_v9  ;;  %v4256_v9 = vcombine.high %v1487_v61, %v1488_v20  ;;  %v4266_v53 = vcombine.high %v1497_v58, %v1498_v28  ;;  %v1502_v49 = vld [vmem:[%s6542_s2 + $0x2b8] sm:$0xff] }
 0x156   :  { %3697 = vmatpush1.bf16.msra.mxu1 %v4253_v22  ;;  %v736_v22 = vld [vmem:[%s6542_s2 + $0x4f0] sm:$0xff]  ;;  %v4271_v20 = vcombine.low %v1501_v16, %v1502_v49 }
 0x157   :  { %3699 = vmatprep.subr.bf16.mxu1 %v4254_v48  ;;  %v4192_v30 = vcombine.high %v733_v42, %v736_v22  ;;  %v742_v48 = vld [vmem:[%s6542_s2 + $0x530] sm:$0xff] }
 0x158   :  { %3509 = vmatpush1.bf16.msra.mxu0 %v4159_v37  ;;  %v706_v37 = vld [vmem:[%s6542_s2 + $0x3b0] sm:$0xff] }
 0x159   :  { %3511 = vmatprep.subr.bf16.mxu0 %v4160_v43  ;;  %v4181_v43 = vcombine.low %v697_v3, %v700_v19  ;;  %v1503_v3 = vld [vmem:[%s6542_s2 + $0x2d8] sm:$0xff] }
 0x15a   :  { %3701 = vmatpush1.bf16.msra.mxu1 %v4255_v27  ;;  %v4270_v27 = vcombine.high %v1501_v16, %v1502_v49  ;;  %v1504_v19 = vld [vmem:[%s6542_s2 + $0x2f8] sm:$0xff] }
 0x15b   :  { %3703 = vmatprep.subr.bf16.mxu1 %v4256_v9  ;;  %v748_v9 = vld [vmem:[%s6542_s2 + $0x570] sm:$0xff] }
 0x15c   :  { %3513 = vmatpush1.bf16.msra.mxu0 %v4161_v60  ;;  %v4182_v60 = vcombine.high %v703_v57, %v706_v37 }
 0x15d   :  { %3515 = vmatprep.subr.bf16.mxu0 %v4162_v33  ;;  %v4258_v33 = vcombine.high %v1489_v31, %v1490_v63  ;;  %v4273_v63 = vcombine.low %v1503_v3, %v1504_v19 }
 0x15e   :  { %3705 = vmatpush1.bf16.msra.mxu1 %v4257_v15  ;;  %v4272_v15 = vcombine.high %v1503_v3, %v1504_v19 }
 0x15f   :  { %3707 = vmatprep.subr.bf16.mxu1 %v4258_v33  ;;  %v754_v33 = vld [vmem:[%s6542_s2 + $0x5b0] sm:$0xff] }
 0x160   :  { %3517 = vmatpush1.bf16.msra.mxu0 %v4163_v29  ;;  %v712_v29 = vld [vmem:[%s6542_s2 + $0x3f0] sm:$0xff] }
 0x161   :  { %3519 = vmatprep.subr.bf16.mxu0 %v4164_v13  ;;  %v4183_v13 = vcombine.low %v703_v57, %v706_v37  ;;  %v1505_v57 = vld [vmem:[%s6542_s2 + $0x318] sm:$0xff] }
 0x162   :  { %3709 = vmatpush1.bf16.msra.mxu1 %v4259_v11  ;;  %v1506_v37 = vld [vmem:[%s6542_s2 + $0x338] sm:$0xff] }
 0x163   :  { %v4274_v11 = vcombine.high %v1505_v57, %v1506_v37 }
 0x164   :  { %3521 = vmatpush1.bf16.msra.mxu0 %v4165_v1  ;;  %v4184_v1 = vcombine.high %v709_v21, %v712_v29 }
 0x165   :  { %3523 = vmatprep.subr.bf16.mxu0 %v4166_v59  ;;  %v4260_v59 = vcombine.high %v1491_v32, %v1492_v56  ;;  %v757_v32 = vld [vmem:[%s6542_s2 + $0x5d0] sm:$0xff] }
 0x166   :  { %v760_v56 = vld [vmem:[%s6542_s2 + $0x5f0] sm:$0xff] }
 0x167   :  { %3711 = vmatprep.subr.bf16.mxu1 %v4260_v59  ;;  %v4200_v59 = vcombine.high %v757_v32, %v760_v56 }
 0x168   :  { %3525 = vmatpush1.bf16.msra.mxu0 %v4167_v17  ;;  %v718_v17 = vld [vmem:[%s6542_s2 + $0x430] sm:$0xff]  ;;  %3713 = vmatpush1.bf16.msra.mxu1 %v4261_v47 }
 0x169   :  { %3527 = vmatprep.subr.bf16.mxu0 %v4168_v38  ;;  %v4185_v38 = vcombine.low %v709_v21, %v712_v29  ;;  %v763_v47 = vld [vmem:[%s6542_s2 + $0x610] sm:$0xff] }
 0x16c   :  { %3529 = vmatpush1.bf16.msra.mxu0 %v4169_v0  ;;  %v4186_v0 = vcombine.high %v715_v4, %v718_v17 }
 0x16d   :  { %3531 = vmatprep.subr.bf16.mxu0 %v4170_v44  ;;  %v4262_v44 = vcombine.high %v1493_v7, %v1494_v2  ;;  %v1508_v7 = vld [vmem:[%s6542_s2 + $0x378] sm:$0xff] }
 0x16e   :  { %v1509_v2 = vld [vmem:[%s6542_s2 + $0x398] sm:$0xff] }
 0x16f   :  { %3715 = vmatprep.subr.bf16.mxu1 %v4262_v44  ;;  %v769_v44 = vld [vmem:[%s6542_s2 + $0x650] sm:$0xff] }
 0x170   :  { %3533 = vmatpush1.bf16.msra.mxu0 %v4171_v39  ;;  %v724_v39 = vld [vmem:[%s6542_s2 + $0x470] sm:$0xff]  ;;  %3717 = vmatpush1.bf16.msra.mxu1 %v4263_v10 }
 0x171   :  { %3535 = vmatprep.subr.bf16.mxu0 %v4172_v41  ;;  %v4187_v41 = vcombine.low %v715_v4, %v718_v17  ;;  %3719 = vmatprep.subr.bf16.mxu1 %v4264_v62  ;;  %v766_v4 = vld [vmem:[%s6542_s2 + $0x630] sm:$0xff]  ;;  %v4201_v17 = vcombine.low %v757_v32, %v760_v56 }
 0x172   :  { %v4203_v62 = vcombine.low %v763_v47, %v766_v4  ;;  %v826_v32 = vld [vmem:[%s6542_s2 + $0x8b0] sm:$0xff] }
 0x174   :  { %3537 = vmatpush1.bf16.msra.mxu0 %v4173_v25  ;;  %v4188_v25 = vcombine.high %v721_v45, %v724_v39  ;;  %3721 = vmatpush1.bf16.msra.mxu1 %v4265_v24 }
 0x175   :  { %3539 = vmatprep.subr.bf16.mxu0 %v4174_v52  ;;  %v727_v52 = vld [vmem:[%s6542_s2 + $0x490] sm:$0xff]  ;;  %3723 = vmatprep.subr.bf16.mxu1 %v4266_v53 }
 0x176   :  { %v4190_v26 = vcombine.high %v727_v52, %v730_v6 }
 0x178   :  { %3541 = vmatpush1.bf16.msra.mxu0 %v4175_v8  ;;  %v4189_v8 = vcombine.low %v721_v45, %v724_v39  ;;  %v1510_v39 = vld [vmem:[%s6542_s2 + $0x3b8] sm:$0xff] }
 0x179   :  { %3543 = vmatprep.subr.bf16.mxu0 %v4176_v5  ;;  %v4267_v5 = vcombine.low %v1497_v58, %v1498_v28  ;;  %v4278_v55 = vcombine.high %v1509_v2, %v1510_v39  ;;  %v4279_v24 = vcombine.low %v1509_v2, %v1510_v39  ;;  %v775_v58 = vld [vmem:[%s6542_s2 + $0x690] sm:$0xff] }
 0x17a   :  { %v778_v28 = vld [vmem:[%s6542_s2 + $0x6b0] sm:$0xff] }
 0x17b   :  { %3725 = vmatpush1.bf16.msra.mxu1 %v4267_v5  ;;  %v4206_v53 = vcombine.high %v775_v58, %v778_v28  ;;  %v6104_v5 = vld [vmem:[%s6542_s2 + $0x418] sm:$0xff]  ;;  %v4207_v16 = vcombine.low %v775_v58, %v778_v28  ;;  %v841_v2 = vld [vmem:[%s6542_s2 + $0x950] sm:$0xff] }
 0x17c   :  { %3545 = vmatpush1.bf16.msra.mxu0 %v4177_v18  ;;  %v4191_v18 = vcombine.low %v727_v52, %v730_v6  ;;  %v850_v39 = vld [vmem:[%s6542_s2 + $0x9b0] sm:$0xff] }
 0x17d   :  { %3547 = vmatprep.subr.bf16.mxu0 %v4178_v34  ;;  %v739_v34 = vld [vmem:[%s6542_s2 + $0x510] sm:$0xff] }
 0x17e   :  { %v4194_v61 = vcombine.high %v739_v34, %v742_v48 }
 0x180   :  { %3549 = vmatpush1.bf16.msra.mxu0 %v4179_v54  ;;  %v4193_v54 = vcombine.low %v733_v42, %v736_v22  ;;  %v6109_v42 = vld [vmem:[%s6542_s2 + $0x438] sm:$0xff] }
 0x181   :  { %3551 = vmatprep.subr.bf16.mxu0 %v4180_v14  ;;  %v745_v14 = vld [vmem:[%s6542_s2 + $0x550] sm:$0xff]  ;;  %v4282_v22 = vcombine.high %v6104_v5, %v6109_v42 }
 0x182   :  { %v4196_v31 = vcombine.high %v745_v14, %v748_v9  ;;  %v4197_v21 = vcombine.low %v745_v14, %v748_v9  ;;  %v805_v9 = vld [vmem:[%s6542_s2 + $0x7d0] sm:$0xff] }
 0x184   :  { %3553 = vmatpush1.bf16.msra.mxu0 %v4181_v43  ;;  %v4195_v43 = vcombine.low %v739_v34, %v742_v48  ;;  %v793_v48 = vld [vmem:[%s6542_s2 + $0x750] sm:$0xff] }
 0x185   :  { %3555 = vmatprep.subr.bf16.mxu0 %v4182_v60  ;;  %v751_v60 = vld [vmem:[%s6542_s2 + $0x590] sm:$0xff] }
 0x186   :  { %v4198_v29 = vcombine.high %v751_v60, %v754_v33 }
 0x188   :  { %3557 = vmatpush1.bf16.msra.mxu0 %v4183_v13  ;;  %v4275_v13 = vcombine.low %v1505_v57, %v1506_v37 }
 0x189   :  { %3559 = vmatprep.subr.bf16.mxu0 %v4184_v1  ;;  %v4199_v1 = vcombine.low %v751_v60, %v754_v33  ;;  %v817_v33 = vld [vmem:[%s6542_s2 + $0x850] sm:$0xff] }
 0x18c   :  { %3561 = vmatpush1.bf16.msra.mxu0 %v4185_v38  ;;  %v1507_v38 = vld [vmem:[%s6542_s2 + $0x358] sm:$0xff] }
 0x18d   :  { %3563 = vmatprep.subr.bf16.mxu0 %v4186_v0  ;;  %v4202_v0 = vcombine.high %v763_v47, %v766_v4  ;;  %v4276_v10 = vcombine.high %v1507_v38, %v1508_v7  ;;  %v4277_v45 = vcombine.low %v1507_v38, %v1508_v7  ;;  %v832_v47 = vld [vmem:[%s6542_s2 + $0x8f0] sm:$0xff] }
 0x18f   :  { %2490 = vmatmul.mubr.f32.vlgmr.msra.gmra.mrb[2].mxu0 %v5321_v46  ;;  %v1500_v46 = vld [vmem:[%s6542_s2 + $0x278] sm:$0xff] }
 0x190   :  { %3565 = vmatpush1.bf16.msra.mxu0 %v4187_v41  ;;  %2560 = vmatprep.mubr.f32.mxu0 %v5395_v12  ;;  %v4268_v12 = vcombine.high %v1499_v50, %v1500_v46  ;;  %v4269_v23 = vcombine.low %v1499_v50, %v1500_v46  ;;  %v772_v41 = vld [vmem:[%s6542_s2 + $0x670] sm:$0xff] }
 0x191   :  { %3567 = vmatprep.subr.bf16.mxu0 %v4188_v25  ;;  %v1512_v25 = vld [vmem:[%s6542_s2 + $0x3f8] sm:$0xff]  ;;  %v4204_v52 = vcombine.high %v769_v44, %v772_v41  ;;  %v4205_v50 = vcombine.low %v769_v44, %v772_v41  ;;  %v781_v46 = vld [vmem:[%s6542_s2 + $0x6d0] sm:$0xff] }
 0x192   :  { %3727 = vmatprep.subr.bf16.mxu1 %v4268_v12  ;;  %v4280_v6 = vcombine.high %v1511_v36, %v1512_v25  ;;  %v4283_v12 = vcombine.low %v6104_v5, %v6109_v42  ;;  %v1521_v5 = vld [vmem:[%s6542_s2 + $0x518] sm:$0xff] }
 0x193   :  { %3729 = vmatpush1.bf16.msra.mxu1 %v4269_v23  ;;  %v1522_v42 = vld [vmem:[%s6542_s2 + $0x538] sm:$0xff] }
 0x194   :  { %3569 = vmatpush1.bf16.msra.mxu0 %v4189_v8  ;;  %3731 = vmatprep.subr.bf16.mxu1 %v4270_v27  ;;  %v4281_v8 = vcombine.low %v1511_v36, %v1512_v25  ;;  %v796_v27 = vld [vmem:[%s6542_s2 + $0x770] sm:$0xff] }
 0x195   :  { %3571 = vmatprep.subr.bf16.mxu0 %v4190_v26  ;;  %v784_v26 = vld [vmem:[%s6542_s2 + $0x6f0] sm:$0xff]  ;;  %v4212_v19 = vcombine.high %v793_v48, %v796_v27 }
 0x196   :  { %v4208_v49 = vcombine.high %v781_v46, %v784_v26  ;;  %v4209_v23 = vcombine.low %v781_v46, %v784_v26  ;;  %v853_v36 = vld [vmem:[%s6542_s2 + $0x9d0] sm:$0xff] }
 0x197   :  { %3733 = vmatpush1.bf16.msra.mxu1 %v4271_v20  ;;  %v4213_v20 = vcombine.low %v793_v48, %v796_v27  ;;  %v856_v25 = vld [vmem:[%s6542_s2 + $0x9f0] sm:$0xff] }
 0x198   :  { %3573 = vmatpush1.bf16.msra.mxu0 %v4191_v18  ;;  %3735 = vmatprep.subr.bf16.mxu1 %v4272_v15  ;;  %v787_v18 = vld [vmem:[%s6542_s2 + $0x710] sm:$0xff]  ;;  %v4233_v58 = vcombine.low %v853_v36, %v856_v25 }
 0x199   :  { %3575 = vmatprep.subr.bf16.mxu0 %v4192_v30  ;;  %v790_v30 = vld [vmem:[%s6542_s2 + $0x730] sm:$0xff] }
 0x19a   :  { %v4210_v34 = vcombine.high %v787_v18, %v790_v30  ;;  %v4211_v3 = vcombine.low %v787_v18, %v790_v30  ;;  %v808_v15 = vld [vmem:[%s6542_s2 + $0x7f0] sm:$0xff] }
 0x19b   :  { %3737 = vmatpush1.bf16.msra.mxu1 %v4273_v63  ;;  %v4216_v37 = vcombine.high %v805_v9, %v808_v15  ;;  %v4217_v63 = vcombine.low %v805_v9, %v808_v15  ;;  %v871_v26 = vld [vmem:[%s6542_s2 + $0xa90] sm:$0xff] }
 0x19c   :  { %3577 = vmatpush1.bf16.msra.mxu0 %v4193_v54  ;;  %3739 = vmatprep.subr.bf16.mxu1 %v4274_v11  ;;  %v799_v54 = vld [vmem:[%s6542_s2 + $0x790] sm:$0xff] }
 0x19d   :  { %3579 = vmatprep.subr.bf16.mxu0 %v4194_v61  ;;  %v802_v61 = vld [vmem:[%s6542_s2 + $0x7b0] sm:$0xff] }
 0x19e   :  { %v4214_v14 = vcombine.high %v799_v54, %v802_v61  ;;  %v4215_v57 = vcombine.low %v799_v54, %v802_v61  ;;  %v820_v11 = vld [vmem:[%s6542_s2 + $0x870] sm:$0xff] }
 0x19f   :  { %3741 = vmatpush1.bf16.msra.mxu1 %v4275_v13  ;;  %v823_v13 = vld [vmem:[%s6542_s2 + $0x890] sm:$0xff]  ;;  %v4221_v56 = vcombine.low %v817_v33, %v820_v11 }
 0x1a0   :  { %3581 = vmatpush1.bf16.msra.mxu0 %v4195_v43  ;;  %3743 = vmatprep.subr.bf16.mxu1 %v4276_v10  ;;  %v811_v43 = vld [vmem:[%s6542_s2 + $0x810] sm:$0xff]  ;;  %v4223_v4 = vcombine.low %v823_v13, %v826_v32 }
 0x1a1   :  { %3583 = vmatprep.subr.bf16.mxu0 %v4196_v31  ;;  %v814_v31 = vld [vmem:[%s6542_s2 + $0x830] sm:$0xff] }
 0x1a2   :  { %v4218_v60 = vcombine.high %v811_v43, %v814_v31  ;;  %v877_v18 = vld [vmem:[%s6542_s2 + $0xad0] sm:$0xff] }
 0x1a3   :  { %3745 = vmatpush1.bf16.msra.mxu1 %v4277_v45  ;;  %v847_v45 = vld [vmem:[%s6542_s2 + $0x990] sm:$0xff] }
 0x1a4   :  { %3585 = vmatpush1.bf16.msra.mxu0 %v4197_v21  ;;  %3747 = vmatprep.subr.bf16.mxu1 %v4278_v55  ;;  %v4219_v21 = vcombine.low %v811_v43, %v814_v31  ;;  %v4230_v55 = vcombine.high %v847_v45, %v850_v39  ;;  %v880_v30 = vld [vmem:[%s6542_s2 + $0xaf0] sm:$0xff] }
 0x1a5   :  { %3587 = vmatprep.subr.bf16.mxu0 %v4198_v29  ;;  %v4220_v29 = vcombine.high %v817_v33, %v820_v11  ;;  %v883_v48 = vld [vmem:[%s6542_s2 + $0xb10] sm:$0xff]  ;;  %v1866_v11 = vlaneseq }
 0x1a6   :  { %v886_v27 = vld [vmem:[%s6542_s2 + $0xb30] sm:$0xff] }
 0x1a7   :  { %3749 = vmatpush1.bf16.msra.mxu1 %v4279_v24  ;;  %v4232_v24 = vcombine.high %v853_v36, %v856_v25  ;;  %v889_v54 = vld [vmem:[%s6542_s2 + $0xb50] sm:$0xff] }
 0x1a8   :  { %3589 = vmatpush1.bf16.msra.mxu0 %v4199_v1  ;;  %3751 = vmatprep.subr.bf16.mxu1 %v4280_v6  ;;  %v4222_v1 = vcombine.high %v823_v13, %v826_v32  ;;  %v862_v6 = vld [vmem:[%s6542_s2 + $0xa30] sm:$0xff]  ;;  %v6245_v32 = vld [vmem:[%s6544_s4] sm:$0x3f] }
 0x1a9   :  { %3591 = vmatprep.subr.bf16.mxu0 %v4200_v59  ;;  %v829_v59 = vld [vmem:[%s6542_s2 + $0x8d0] sm:$0xff] }
 0x1aa   :  { %v4225_v38 = vcombine.low %v829_v59, %v832_v47  ;;  %v892_v61 = vld [vmem:[%s6542_s2 + $0xb70] sm:$0xff] }
 0x1ab   :  { %3753 = vmatpush1.bf16.msra.mxu1 %v4281_v8  ;;  %v868_v8 = vld [vmem:[%s6542_s2 + $0xa70] sm:$0xff] }
 0x1ac   :  { %3593 = vmatpush1.bf16.msra.mxu0 %v4201_v17  ;;  %3755 = vmatprep.subr.bf16.mxu1 %v4282_v22  ;;  %v4224_v17 = vcombine.high %v829_v59, %v832_v47  ;;  %v874_v22 = vld [vmem:[%s6542_s2 + $0xab0] sm:$0xff] }
 0x1ad   :  { %3595 = vmatprep.subr.bf16.mxu0 %v4202_v0  ;;  %v844_v0 = vld [vmem:[%s6542_s2 + $0x970] sm:$0xff] }
 0x1ae   :  { %v4228_v10 = vcombine.high %v841_v2, %v844_v0  ;;  %v4229_v41 = vcombine.low %v841_v2, %v844_v0  ;;  %v895_v9 = vld [vmem:[%s6542_s2 + $0xb90] sm:$0xff]  ;;  %v1515_v2 = vld [vmem:[%s6542_s2 + $0x458] sm:$0xff] }
 0x1af   :  { %v898_v15 = vld [vmem:[%s6542_s2 + $0xbb0] sm:$0xff]  ;;  %v1516_v0 = vld [vmem:[%s6542_s2 + $0x478] sm:$0xff] }
 0x1b0   :  { %3597 = vmatpush1.bf16.msra.mxu0 %v4203_v62  ;;  %v4231_v62 = vcombine.low %v847_v45, %v850_v39  ;;  %v901_v43 = vld [vmem:[%s6542_s2 + $0xbd0] sm:$0xff]  ;;  %v1517_v39 = vld [vmem:[%s6542_s2 + $0x498] sm:$0xff]  ;;  %v4285_v36 = vcombine.low %v1515_v2, %v1516_v0 }
 0x1b1   :  { %3599 = vmatprep.subr.bf16.mxu0 %v4204_v52  ;;  %v859_v52 = vld [vmem:[%s6542_s2 + $0xa10] sm:$0xff] }
 0x1b2   :  { %v4234_v28 = vcombine.high %v859_v52, %v862_v6  ;;  %v904_v31 = vld [vmem:[%s6542_s2 + $0xbf0] sm:$0xff] }
 0x1b3   :  { %v4249_v33 = vcombine.low %v901_v43, %v904_v31 }
 0x1b4   :  { %3601 = vmatpush1.bf16.msra.mxu0 %v4205_v50  ;;  %v865_v50 = vld [vmem:[%s6542_s2 + $0xa50] sm:$0xff] }
 0x1b5   :  { %3603 = vmatprep.subr.bf16.mxu0 %v4206_v53  ;;  %v4235_v53 = vcombine.low %v859_v52, %v862_v6  ;;  %v4236_v46 = vcombine.high %v865_v50, %v868_v8 }
 0x1b8   :  { %3605 = vmatpush1.bf16.msra.mxu0 %v4207_v16  ;;  %v4237_v16 = vcombine.low %v865_v50, %v868_v8  ;;  %v1524_v50 = vld [vmem:[%s6542_s2 + $0x578] sm:$0xff]  ;;  %v4291_v8 = vcombine.low %v1521_v5, %v1522_v42 }
 0x1b9   :  { %3607 = vmatprep.subr.bf16.mxu0 %v4208_v49  ;;  %v4238_v49 = vcombine.high %v871_v26, %v874_v22 }
 0x1bc   :  { %3609 = vmatpush1.bf16.msra.mxu0 %v4209_v23  ;;  %v4239_v23 = vcombine.low %v871_v26, %v874_v22  ;;  %v1526_v26 = vld [vmem:[%s6542_s2 + $0x5b8] sm:$0xff] }
 0x1bd   :  { %3611 = vmatprep.subr.bf16.mxu0 %v4210_v34  ;;  %v4240_v34 = vcombine.high %v877_v18, %v880_v30 }
 0x1c0   :  { %3613 = vmatpush1.bf16.msra.mxu0 %v4211_v3  ;;  %v4241_v3 = vcombine.low %v877_v18, %v880_v30  ;;  %v1528_v18 = vld [vmem:[%s6542_s2 + $0x5f8] sm:$0xff] }
 0x1c1   :  { %3615 = vmatprep.subr.bf16.mxu0 %v4212_v19  ;;  %v4242_v19 = vcombine.high %v883_v48, %v886_v27 }
 0x1c4   :  { %3617 = vmatpush1.bf16.msra.mxu0 %v4213_v20  ;;  %v4243_v20 = vcombine.low %v883_v48, %v886_v27  ;;  %v1530_v48 = vld [vmem:[%s6542_s2 + $0x638] sm:$0xff] }
 0x1c5   :  { %3619 = vmatprep.subr.bf16.mxu0 %v4214_v14  ;;  %v4244_v14 = vcombine.high %v889_v54, %v892_v61 }
 0x1c8   :  { %3621 = vmatpush1.bf16.msra.mxu0 %v4215_v57  ;;  %v4245_v57 = vcombine.low %v889_v54, %v892_v61  ;;  %v1532_v54 = vld [vmem:[%s6542_s2 + $0x678] sm:$0xff] }
 0x1c9   :  { %3623 = vmatprep.subr.bf16.mxu0 %v4216_v37  ;;  %v4246_v37 = vcombine.high %v895_v9, %v898_v15 }
 0x1cc   :  { %3625 = vmatpush1.bf16.msra.mxu0 %v4217_v63  ;;  %v4247_v63 = vcombine.low %v895_v9, %v898_v15  ;;  %v1534_v9 = vld [vmem:[%s6542_s2 + $0x6b8] sm:$0xff] }
 0x1cd   :  { %3627 = vmatprep.subr.bf16.mxu0 %v4218_v60  ;;  %v4248_v60 = vcombine.high %v901_v43, %v904_v31  ;;  %v1536_v43 = vld [vmem:[%s6542_s2 + $0x6f8] sm:$0xff] }
 0x1cf   :  { %2561 = vmatmul.mubr.f32.vlgmr.msra.gmra.mrb[2].mxu0 %v5461_v40  ;;  %v835_v40 = vld [vmem:[%s6542_s2 + $0x910] sm:$0xff] }
 0x1d0   :  { %3629 = vmatpush1.bf16.msra.mxu0 %v4219_v21  ;;  %2631 = vmatprep.mubr.f32.mxu0 %v5546_v35  ;;  %v838_v35 = vld [vmem:[%s6542_s2 + $0x930] sm:$0xff]  ;;  %v6238_v21 = vshrl.u32 %v1866_v11, 7 }
 0x1d1   :  { %3631 = vmatprep.subr.bf16.mxu0 %v4220_v29  ;;  %v4226_v7 = vcombine.high %v835_v40, %v838_v35  ;;  %v4227_v44 = vcombine.low %v835_v40, %v838_v35 }
 0x1d2   :  { %v1868_v29 = vsub.s32 0, %v6238_v21  ;;  %v1872_v13 = vsub.s32 1, %v6238_v21  ;;  %v1876_v11 = vsub.s32 2, %v6238_v21 }
 0x1d4   :  { %3633 = vmatpush1.bf16.msra.mxu0 %v4221_v56  ;;  %v1880_v56 = vsub.s32 3, %v6238_v21 }
 0x1d5   :  { %3635 = vmatprep.subr.bf16.mxu0 %v4222_v1  ;;  %v1869_v1 = vrot.slane %v6245_v32, %v1868_v29 }
 0x1d6   :  { %v1881_v59 = vrot.slane %v6245_v32, %v1880_v56 }
 0x1d8   :  { %3637 = vmatpush1.bf16.msra.mxu0 %v4223_v4 }
 0x1d9   :  { %3639 = vmatprep.subr.bf16.mxu0 %v4224_v17 }
 0x1dc   :  { %3641 = vmatpush1.bf16.msra.mxu0 %v4225_v38 }
 0x1dd   :  { %3643 = vmatprep.subr.bf16.mxu0 %v4226_v7 }
 0x1e0   :  { %3645 = vmatpush1.bf16.msra.mxu0 %v4227_v44 }
 0x1e1   :  { %3647 = vmatprep.subr.bf16.mxu0 %v4228_v10  ;;  %v4284_v10 = vcombine.high %v1515_v2, %v1516_v0 }
 0x1e4   :  { %3649 = vmatpush1.bf16.msra.mxu0 %v4229_v41  ;;  %v1518_v41 = vld [vmem:[%s6542_s2 + $0x4b8] sm:$0xff] }
 0x1e5   :  { %3651 = vmatprep.subr.bf16.mxu0 %v4230_v55  ;;  %v4286_v25 = vcombine.high %v1517_v39, %v1518_v41  ;;  %v4287_v52 = vcombine.low %v1517_v39, %v1518_v41  ;;  %v1546_v41 = vld [vmem:[%s6542_s2 + $0x838] sm:$0xff] }
 0x1e8   :  { %3653 = vmatpush1.bf16.msra.mxu0 %v4231_v62  ;;  %v1519_v62 = vld [vmem:[%s6542_s2 + $0x4d8] sm:$0xff] }
 0x1e9   :  { %3655 = vmatprep.subr.bf16.mxu0 %v4232_v24  ;;  %v1520_v24 = vld [vmem:[%s6542_s2 + $0x4f8] sm:$0xff] }
 0x1ea   :  { %v4288_v6 = vcombine.high %v1519_v62, %v1520_v24 }
 0x1ec   :  { %3657 = vmatpush1.bf16.msra.mxu0 %v4233_v58  ;;  %v4290_v58 = vcombine.high %v1521_v5, %v1522_v42  ;;  %v1549_v5 = vld [vmem:[%s6542_s2 + $0x898] sm:$0xff] }
 0x1ed   :  { %3659 = vmatprep.subr.bf16.mxu0 %v4234_v28  ;;  %v1523_v28 = vld [vmem:[%s6542_s2 + $0x558] sm:$0xff] }
 0x1ee   :  { %v4293_v22 = vcombine.low %v1523_v28, %v1524_v50  ;;  %v1550_v42 = vld [vmem:[%s6542_s2 + $0x8b8] sm:$0xff] }
 0x1f0   :  { %3661 = vmatpush1.bf16.msra.mxu0 %v4235_v53  ;;  %v4292_v53 = vcombine.high %v1523_v28, %v1524_v50  ;;  %v1551_v28 = vld [vmem:[%s6542_s2 + $0x8d8] sm:$0xff] }
 0x1f1   :  { %3663 = vmatprep.subr.bf16.mxu0 %v4236_v46  ;;  %v1525_v46 = vld [vmem:[%s6542_s2 + $0x598] sm:$0xff] }
 0x1f2   :  { %v4295_v30 = vcombine.low %v1525_v46, %v1526_v26  ;;  %v1552_v50 = vld [vmem:[%s6542_s2 + $0x8f8] sm:$0xff] }
 0x1f4   :  { %3665 = vmatpush1.bf16.msra.mxu0 %v4237_v16  ;;  %v4294_v16 = vcombine.high %v1525_v46, %v1526_v26  ;;  %v4378_v46 = vld [vmem:[%s6545_s3 + $0x90] ss:$8 sps:$4 sm:$0xff]  }
 0x1f5   :  { %3667 = vmatprep.subr.bf16.mxu0 %v4238_v49  ;;  %v1527_v49 = vld [vmem:[%s6542_s2 + $0x5d8] sm:$0xff] }
 0x1f6   :  { %v4297_v27 = vcombine.low %v1527_v49, %v1528_v18  ;;  %v4379_v26 = vld [vmem:[%s6545_s3 + $0x10] ss:$8 sps:$4 sm:$0xff]  }
 0x1f8   :  { %3669 = vmatpush1.bf16.msra.mxu0 %v4239_v23  ;;  %v4296_v23 = vcombine.high %v1527_v49, %v1528_v18  ;;  %v1553_v49 = vld [vmem:[%s6542_s2 + $0x918] sm:$0xff]  ;;  %v4320_v18 = vcombine.high %v1551_v28, %v1552_v50 }
 0x1f9   :  { %3671 = vmatprep.subr.bf16.mxu0 %v4240_v34  ;;  %v1529_v34 = vld [vmem:[%s6542_s2 + $0x618] sm:$0xff] }
 0x1fa   :  { %v4299_v61 = vcombine.low %v1529_v34, %v1530_v48 }
 0x1fc   :  { %3673 = vmatpush1.bf16.msra.mxu0 %v4241_v3  ;;  %v4298_v3 = vcombine.high %v1529_v34, %v1530_v48  ;;  %v4382_v34 = vld [vmem:[%s6545_s3 + $0xb0] ss:$8 sps:$4 sm:$0xff]   ;;  %v4321_v48 = vcombine.low %v1551_v28, %v1552_v50 }
 0x1fd   :  { %3675 = vmatprep.subr.bf16.mxu0 %v4242_v19  ;;  %v1531_v19 = vld [vmem:[%s6542_s2 + $0x658] sm:$0xff] }
 0x1fe   :  { %v4301_v15 = vcombine.low %v1531_v19, %v1532_v54 }
 0x200   :  { %3677 = vmatpush1.bf16.msra.mxu0 %v4243_v20  ;;  %v4300_v20 = vcombine.high %v1531_v19, %v1532_v54  ;;  %v1556_v19 = vld [vmem:[%s6542_s2 + $0x978] sm:$0xff] }
 0x201   :  { %3679 = vmatprep.subr.bf16.mxu0 %v4244_v14  ;;  %v1533_v14 = vld [vmem:[%s6542_s2 + $0x698] sm:$0xff] }
 0x202   :  { %v4303_v31 = vcombine.low %v1533_v14, %v1534_v9  ;;  %v4383_v54 = vld [vmem:[%s6545_s3 + $0x30] ss:$8 sps:$4 sm:$0xff]  }
 0x204   :  { %3681 = vmatpush1.bf16.msra.mxu0 %v4245_v57  ;;  %v4302_v57 = vcombine.high %v1533_v14, %v1534_v9  ;;  %v1557_v14 = vld [vmem:[%s6542_s2 + $0x998] sm:$0xff] }
 0x205   :  { %3683 = vmatprep.subr.bf16.mxu0 %v4246_v37  ;;  %v1535_v37 = vld [vmem:[%s6542_s2 + $0x6d8] sm:$0xff] }
 0x206   :  { %v4305_v56 = vcombine.low %v1535_v37, %v1536_v43  ;;  %v1558_v9 = vld [vmem:[%s6542_s2 + $0x9b8] sm:$0xff] }
 0x208   :  { %3685 = vmatpush1.bf16.msra.mxu0 %v4247_v63  ;;  %v4304_v63 = vcombine.high %v1535_v37, %v1536_v43  ;;  %v4386_v37 = vld [vmem:[%s6545_s3 + $0xd0] ss:$8 sps:$4 sm:$0xff]  }
 0x209   :  { %3687 = vmatprep.subr.bf16.mxu0 %v4248_v60  ;;  %v1537_v60 = vld [vmem:[%s6542_s2 + $0x718] sm:$0xff] }
 0x20c   :  { %3689 = vmatpush1.bf16.msra.mxu0 %v4249_v33  ;;  %v1538_v33 = vld [vmem:[%s6542_s2 + $0x738] sm:$0xff] }
 0x20f   :  { %2632 = vmatmul.mubr.f32.vlgmr.msra.gmra.mrb[2].mxu0 %v5634_v51  ;;  %v1873_v51 = vrot.slane %v6245_v32, %v1872_v13 }
 0x222   :  { %v2207_v47 = vpop.f32.mrb[0].mxu0 }
 0x223   :  { %v6255_v4 = vpop.f32.mrb[0].mxu1  ;;  %v2209_v17 = vpop.f32.mrb[1].mxu0  ;;  %v3938_v40 = vadd.f32 %v2207_v47, %v1869_v1  ;;  %v4306_v1 = vcombine.high %v1537_v60, %v1538_v33  ;;  %v1877_v47 = vrot.slane %v6245_v32, %v1876_v11  ;;  %v4388_v11 = vld [vmem:[%s6545_s3 + $0xe0] ss:$8 sps:$4 sm:$0xff]  }
 0x224   :  { %v3939_v35 = vadd.f32 %v2209_v17, %v1873_v51  ;;  %v2422_v38 = vpop.f32.mrb[1].mxu1  ;;  %v1539_v51 = vld [vmem:[%s6542_s2 + $0x758] sm:$0xff]  ;;  %v4307_v17 = vcombine.low %v1537_v60, %v1538_v33  ;;  %v4326_v33 = vcombine.high %v1557_v14, %v1558_v9 }
 0x225   :  { %v3941_v7 = vadd.f32 %v2422_v38, %v1881_v59  ;;  %v1540_v59 = vld [vmem:[%s6542_s2 + $0x778] sm:$0xff] }
 0x226   :  { %4416 = vtanh.f32 %v3939_v35  ;;  %v1541_v35 = vld [vmem:[%s6542_s2 + $0x798] sm:$0xff]  ;;  %v4309_v2 = vcombine.low %v1539_v51, %v1540_v59 }
 0x227   :  { %4418 = vtanh.f32 %v3938_v40  ;;  %v4308_v40 = vcombine.high %v1539_v51, %v1540_v59  ;;  %v1542_v38 = vld [vmem:[%s6542_s2 + $0x7b8] sm:$0xff] }
 0x228   :  { %4420 = vtanh.f32 %v3941_v7  ;;  %v3940_v7 = vadd.f32 %v6255_v4, %v1877_v47  ;;  %v4310_v0 = vcombine.high %v1541_v35, %v1542_v38  ;;  %v1545_v4 = vld [vmem:[%s6542_s2 + $0x818] sm:$0xff]  ;;  %v4389_v47 = vld [vmem:[%s6545_s3 + $0x60] ss:$8 sps:$4 sm:$0xff]  }
 0x229   :  { %v4387_v60 = vld [vmem:[%s6545_s3 + $0x50] ss:$8 sps:$4 sm:$0xff]  }
 0x22a   :  { %4422 = vtanh.f32 %v3940_v7  ;;  %v1561_v51 = vld [vmem:[%s6542_s2 + $0xa18] sm:$0xff] }
 0x22b   :  { %v1562_v59 = vld [vmem:[%s6542_s2 + $0xa38] sm:$0xff] }
 0x22c   :  { %v4331_v7 = vcombine.low %v1561_v51, %v1562_v59 }
 0x230   :  { %v4417_v44 = vpop.eup %4416 }
 0x231   :  { %v4419_v45 = vpop.eup %4418  ;;  %2719 = vmatprep.mubr.f32.mxu1 %v4417_v44  ;;  %v1543_v44 = vld [vmem:[%s6542_s2 + $0x7d8] sm:$0xff] }
 0x232   :  { %v4421_v55 = vpop.eup %4420  ;;  %2720 = vmatmul.mubr.f32.vlgmr.msra.gmra.mrb[2].mxu1 %v4419_v45  ;;  %v4311_v45 = vcombine.low %v1541_v35, %v1542_v38  ;;  %v1563_v35 = vld [vmem:[%s6542_s2 + $0xa58] sm:$0xff] }
 0x233   :  { %3757 = vmatpush1.bf16.msra.mxu1 %v4283_v12  ;;  %2790 = vmatprep.mubr.f32.mxu1 %v4421_v55  ;;  %v4289_v12 = vcombine.low %v1519_v62, %v1520_v24  ;;  %v1548_v62 = vld [vmem:[%s6542_s2 + $0x878] sm:$0xff]  ;;  %v4315_v24 = vcombine.low %v1545_v4, %v1546_v41 }
 0x234   :  { %3759 = vmatprep.subr.bf16.mxu1 %v4284_v10  ;;  %v1544_v10 = vld [vmem:[%s6542_s2 + $0x7f8] sm:$0xff] }
 0x235   :  { %v4312_v39 = vcombine.high %v1543_v44, %v1544_v10  ;;  %v4313_v55 = vcombine.low %v1543_v44, %v1544_v10  ;;  %v1564_v38 = vld [vmem:[%s6542_s2 + $0xa78] sm:$0xff] }
 0x236   :  { %v1566_v44 = vld [vmem:[%s6542_s2 + $0xab8] sm:$0xff]  ;;  %v4333_v10 = vcombine.low %v1563_v35, %v1564_v38 }
 0x237   :  { %3761 = vmatpush1.bf16.msra.mxu1 %v4285_v36  ;;  %v4314_v36 = vcombine.high %v1545_v4, %v1546_v41  ;;  %v1568_v4 = vld [vmem:[%s6542_s2 + $0xaf8] sm:$0xff] }
 0x238   :  { %3763 = vmatprep.subr.bf16.mxu1 %v4286_v25  ;;  %v1547_v25 = vld [vmem:[%s6542_s2 + $0x858] sm:$0xff] }
 0x23b   :  { %3765 = vmatpush1.bf16.msra.mxu1 %v4287_v52  ;;  %v4316_v52 = vcombine.high %v1547_v25, %v1548_v62 }
 0x23c   :  { %3767 = vmatprep.subr.bf16.mxu1 %v4288_v6  ;;  %v4423_v6 = vpop.eup %4422 }
 0x23f   :  { %3769 = vmatpush1.bf16.msra.mxu1 %v4289_v12  ;;  %v4376_v12 = vld [vmem:[%s6545_s3 + $0x80] ss:$8 sps:$4 sm:$0xff]  }
 0x240   :  { %3771 = vmatprep.subr.bf16.mxu1 %v4290_v58  ;;  %v4317_v58 = vcombine.low %v1547_v25, %v1548_v62  ;;  %3883 = vmatprep.subr.bf16.mxu0 %v4376_v12  ;;  %v1570_v25 = vld [vmem:[%s6542_s2 + $0xb38] sm:$0xff] }
 0x241   :  { %v1573_v12 = vld [vmem:[%s6542_s2 + $0xb98] sm:$0xff] }
 0x243   :  { %3773 = vmatpush1.bf16.msra.mxu1 %v4291_v8  ;;  %v4377_v8 = vld [vmem:[%s6545_s3] ss:$8 sps:$4 sm:$0xff]  }
 0x244   :  { %3775 = vmatprep.subr.bf16.mxu1 %v4292_v53  ;;  %v4318_v53 = vcombine.high %v1549_v5, %v1550_v42  ;;  %3885 = vmatpush3.bf16.msra.mxu0 %v4377_v8  ;;  %v1575_v8 = vld [vmem:[%s6542_s2 + $0xbd8] sm:$0xff] }
 0x245   :  { %3887 = vmatprep.subr.bf16.mxu0 %v4378_v46 }
 0x247   :  { %3777 = vmatpush1.bf16.msra.mxu1 %v4293_v22  ;;  %v4380_v22 = vld [vmem:[%s6545_s3 + $0xa0] ss:$8 sps:$4 sm:$0xff]  }
 0x248   :  { %3779 = vmatprep.subr.bf16.mxu1 %v4294_v16  ;;  %v4319_v16 = vcombine.low %v1549_v5, %v1550_v42  ;;  %3889 = vmatpush3.bf16.msra.mxu0 %v4379_v26 }
 0x249   :  { %3891 = vmatprep.subr.bf16.mxu0 %v4380_v22 }
 0x24b   :  { %3781 = vmatpush1.bf16.msra.mxu1 %v4295_v30  ;;  %v1554_v30 = vld [vmem:[%s6542_s2 + $0x938] sm:$0xff] }
 0x24c   :  { %3783 = vmatprep.subr.bf16.mxu1 %v4296_v23  ;;  %v4381_v23 = vld [vmem:[%s6545_s3 + $0x20] ss:$8 sps:$4 sm:$0xff]  }
 0x24d   :  { %3893 = vmatpush3.bf16.msra.mxu0 %v4381_v23 }
 0x24e   :  { %3895 = vmatprep.subr.bf16.mxu0 %v4382_v34 }
 0x24f   :  { %3785 = vmatpush1.bf16.msra.mxu1 %v4297_v27  ;;  %v1555_v27 = vld [vmem:[%s6542_s2 + $0x958] sm:$0xff] }
 0x250   :  { %3787 = vmatprep.subr.bf16.mxu1 %v4298_v3  ;;  %v4322_v3 = vcombine.high %v1553_v49, %v1554_v30  ;;  %v4325_v43 = vcombine.low %v1555_v27, %v1556_v19 }
 0x251   :  { %3897 = vmatpush3.bf16.msra.mxu0 %v4383_v54  ;;  %v4390_v54 = vld [vmem:[%s6545_s3 + $0xf0] ss:$8 sps:$4 sm:$0xff]  }
 0x253   :  { %3789 = vmatpush1.bf16.msra.mxu1 %v4299_v61  ;;  %v4384_v61 = vld [vmem:[%s6545_s3 + $0xc0] ss:$8 sps:$4 sm:$0xff]  }
 0x254   :  { %3791 = vmatprep.subr.bf16.mxu1 %v4300_v20  ;;  %v4323_v20 = vcombine.low %v1553_v49, %v1554_v30  ;;  %3899 = vmatprep.subr.bf16.mxu0 %v4384_v61  ;;  %v1888_v49 = vsub.s32 5, %v6238_v21  ;;  %v4391_v61 = vld [vmem:[%s6545_s3 + $0x70] ss:$8 sps:$4 sm:$0xff]  }
 0x256   :  { %v1889_v30 = vrot.slane %v6245_v32, %v1888_v49 }
 0x257   :  { %3793 = vmatpush1.bf16.msra.mxu1 %v4301_v15  ;;  %v4385_v15 = vld [vmem:[%s6545_s3 + $0x40] ss:$8 sps:$4 sm:$0xff]  }
 0x258   :  { %3795 = vmatprep.subr.bf16.mxu1 %v4302_v57  ;;  %v4324_v57 = vcombine.high %v1555_v27, %v1556_v19  ;;  %3901 = vmatpush3.bf16.msra.mxu0 %v4385_v15  ;;  %v4395_v15 = vld [vmem:[%s6545_s3 + $0x34] ss:$8 sps:$4 sm:$0xff]  }
 0x259   :  { %3903 = vmatprep.subr.bf16.mxu0 %v4386_v37  ;;  %v4397_v37 = vld [vmem:[%s6545_s3 + $0x54] ss:$8 sps:$4 sm:$0xff]  }
 0x25b   :  { %3797 = vmatpush1.bf16.msra.mxu1 %v4303_v31  ;;  %v1559_v31 = vld [vmem:[%s6542_s2 + $0x9d8] sm:$0xff] }
 0x25c   :  { %3799 = vmatprep.subr.bf16.mxu1 %v4304_v63  ;;  %v1560_v63 = vld [vmem:[%s6542_s2 + $0x9f8] sm:$0xff]  ;;  %3905 = vmatpush3.bf16.msra.mxu0 %v4387_v60 }
 0x25d   :  { %3907 = vmatprep.subr.bf16.mxu0 %v4388_v11 }
 0x25f   :  { %3801 = vmatpush1.bf16.msra.mxu1 %v4305_v56  ;;  %v4327_v56 = vcombine.low %v1557_v14, %v1558_v9  ;;  %v4393_v14 = vld [vmem:[%s6545_s3 + $0x14] ss:$8 sps:$4 sm:$0xff]   ;;  %v4394_v9 = vld [vmem:[%s6545_s3 + $0x24] ss:$8 sps:$4 sm:$0xff]  }
 0x260   :  { %3803 = vmatprep.subr.bf16.mxu1 %v4306_v1  ;;  %v4328_v1 = vcombine.high %v1559_v31, %v1560_v63  ;;  %3909 = vmatpush3.bf16.msra.mxu0 %v4389_v47 }
 0x261   :  { %3911 = vmatprep.subr.bf16.mxu0 %v4390_v54 }
 0x263   :  { %3805 = vmatpush1.bf16.msra.mxu1 %v4307_v17  ;;  %v4329_v17 = vcombine.low %v1559_v31, %v1560_v63  ;;  %v614_v31 = vld [vmem:[%s6544_s4 + $0x6] sm:$0x3] }
 0x264   :  { %3807 = vmatprep.subr.bf16.mxu1 %v4308_v40  ;;  %v4330_v40 = vcombine.high %v1561_v51, %v1562_v59  ;;  %3913 = vmatpush3.bf16.msra.mxu0 %v4391_v61  ;;  %v2652_v63 = vrot.slane %v614_v31, %v1872_v13  ;;  %v2648_v60 = vrot.slane %v614_v31, %v1868_v29  ;;  %v4399_v51 = vld [vmem:[%s6545_s3 + $0x74] ss:$8 sps:$4 sm:$0xff]   ;;  %v4431_v59 = vmov 0.0  }
 0x267   :  { %3809 = vmatpush1.bf16.msra.mxu1 %v4309_v2  ;;  %v4332_v2 = vcombine.high %v1563_v35, %v1564_v38 }
 0x268   :  { %3811 = vmatprep.subr.bf16.mxu1 %v4310_v0  ;;  %v1565_v0 = vld [vmem:[%s6542_s2 + $0xa98] sm:$0xff] }
 0x269   :  { %v4335_v41 = vcombine.low %v1565_v0, %v1566_v44 }
 0x26b   :  { %3813 = vmatpush1.bf16.msra.mxu1 %v4311_v45  ;;  %v4334_v45 = vcombine.high %v1565_v0, %v1566_v44 }
 0x26c   :  { %3815 = vmatprep.subr.bf16.mxu1 %v4312_v39  ;;  %v1567_v39 = vld [vmem:[%s6542_s2 + $0xad8] sm:$0xff] }
 0x26d   :  { %v4337_v62 = vcombine.low %v1567_v39, %v1568_v4 }
 0x26f   :  { %3817 = vmatpush1.bf16.msra.mxu1 %v4313_v55  ;;  %v4336_v55 = vcombine.high %v1567_v39, %v1568_v4 }
 0x270   :  { %3819 = vmatprep.subr.bf16.mxu1 %v4314_v36  ;;  %v1569_v36 = vld [vmem:[%s6542_s2 + $0xb18] sm:$0xff] }
 0x271   :  { %v4339_v5 = vcombine.low %v1569_v36, %v1570_v25 }
 0x272   :  { %2791 = vmatmul.mubr.f32.vlgmr.msra.gmra.mrb[2].mxu1 %v4423_v6  ;;  %v1572_v6 = vld [vmem:[%s6542_s2 + $0xb78] sm:$0xff] }
 0x273   :  { %3821 = vmatpush1.bf16.msra.mxu1 %v4315_v24  ;;  %v4338_v24 = vcombine.high %v1569_v36, %v1570_v25 }
 0x274   :  { %3823 = vmatprep.subr.bf16.mxu1 %v4316_v52  ;;  %v1571_v52 = vld [vmem:[%s6542_s2 + $0xb58] sm:$0xff] }
 0x275   :  { %v4340_v42 = vcombine.high %v1571_v52, %v1572_v6  ;;  %v4341_v28 = vcombine.low %v1571_v52, %v1572_v6 }
 0x277   :  { %3825 = vmatpush1.bf16.msra.mxu1 %v4317_v58  ;;  %v1574_v58 = vld [vmem:[%s6542_s2 + $0xbb8] sm:$0xff] }
 0x278   :  { %3827 = vmatprep.subr.bf16.mxu1 %v4318_v53  ;;  %v4342_v50 = vcombine.high %v1573_v12, %v1574_v58  ;;  %v1576_v53 = vld [vmem:[%s6542_s2 + $0xbf8] sm:$0xff]  ;;  %v4343_v46 = vcombine.low %v1573_v12, %v1574_v58 }
 0x279   :  { %v4344_v26 = vcombine.high %v1575_v8, %v1576_v53  ;;  %v4345_v22 = vcombine.low %v1575_v8, %v1576_v53 }
 0x27b   :  { %3829 = vmatpush1.bf16.msra.mxu1 %v4319_v16  ;;  %v1884_v16 = vsub.s32 4, %v6238_v21  ;;  %v3025_v21 = vld [vmem:[%s6544_s4 + $0x8] ss:$0 sm:$0xff] }
 0x27c   :  { %3831 = vmatprep.subr.bf16.mxu1 %v4320_v18 }
 0x27d   :  { %v1885_v18 = vrot.slane %v6245_v32, %v1884_v16  ;;  %v4392_v32 = vld [vmem:[%s6545_s3 + $0x4] ss:$8 sps:$4 sm:$0xff]  }
 0x27f   :  { %3833 = vmatpush1.bf16.msra.mxu1 %v4321_v48 }
 0x280   :  { %3835 = vmatprep.subr.bf16.mxu1 %v4322_v3 }
 0x283   :  { %3837 = vmatpush1.bf16.msra.mxu1 %v4323_v20  ;;  %v4429_v20 = vmov 0.0|0.0  }
 0x284   :  { %3839 = vmatprep.subr.bf16.mxu1 %v4324_v57  ;;  %v4396_v57 = vld [vmem:[%s6545_s3 + $0x44] ss:$8 sps:$4 sm:$0xff]  }
 0x287   :  { %3841 = vmatpush1.bf16.msra.mxu1 %v4325_v43  ;;  %v4398_v43 = vld [vmem:[%s6545_s3 + $0x64] ss:$8 sps:$4 sm:$0xff]  }
 0x288   :  { %3843 = vmatprep.subr.bf16.mxu1 %v4326_v33 }
 0x28b   :  { %3845 = vmatpush1.bf16.msra.mxu1 %v4327_v56 }
 0x28c   :  { %3847 = vmatprep.subr.bf16.mxu1 %v4328_v1 }
 0x28f   :  { %3849 = vmatpush1.bf16.msra.mxu1 %v4329_v17 }
 0x290   :  { %3851 = vmatprep.subr.bf16.mxu1 %v4330_v40  ;;  %v3026_v40 = vld [vmem:[%s6544_s4 + $0x9] ss:$0 sm:$0xff] }
 0x293   :  { %3853 = vmatpush1.bf16.msra.mxu1 %v4331_v7 }
 0x294   :  { %3855 = vmatprep.subr.bf16.mxu1 %v4332_v2 }
 0x297   :  { %3857 = vmatpush1.bf16.msra.mxu1 %v4333_v10 }
 0x298   :  { %3859 = vmatprep.subr.bf16.mxu1 %v4334_v45 }
 0x29b   :  { %3861 = vmatpush1.bf16.msra.mxu1 %v4335_v41 }
 0x29c   :  { %3863 = vmatprep.subr.bf16.mxu1 %v4336_v55 }
 0x29f   :  { %3865 = vmatpush1.bf16.msra.mxu1 %v4337_v62 }
 0x2a0   :  { %3867 = vmatprep.subr.bf16.mxu1 %v4338_v24 }
 0x2a3   :  { %3869 = vmatpush1.bf16.msra.mxu1 %v4339_v5 }
 0x2a4   :  { %3871 = vmatprep.subr.bf16.mxu1 %v4340_v42 }
 0x2a7   :  { %3873 = vmatpush1.bf16.msra.mxu1 %v4341_v28 }
 0x2a8   :  { %3875 = vmatprep.subr.bf16.mxu1 %v4342_v50 }
 0x2ab   :  { %3877 = vmatpush1.bf16.msra.mxu1 %v4343_v46 }
 0x2ac   :  { %3879 = vmatprep.subr.bf16.mxu1 %v4344_v26 }
 0x2af   :  { %3881 = vmatpush1.bf16.msra.mxu1 %v4345_v22 }
 0x2b0   :  { %3914 = vmatprep.subr.bf16.mxu1 %v4429_v20 }
 0x2e2   :  { %v2633_v23 = vpop.f32.mrb[2].mxu0 }
 0x2e3   :  { %v3942_v34 = vadd.f32 %v2633_v23, %v1885_v18  ;;  %v2635_v48 = vpop.f32.mrb[3].mxu0 }
 0x2e4   :  { %v3943_v27 = vadd.f32 %v2635_v48, %v1889_v30 }
 0x2e6   :  { %4424 = vtanh.f32 %v3943_v27 }
 0x2e7   :  { %4426 = vtanh.f32 %v3942_v34 }
 0x2f0   :  { %v4425_v3 = vpop.eup %4424 }
 0x2f1   :  { %v4427_v19 = vpop.eup %4426  ;;  %2861 = vmatprep.mubr.f32.mxu1 %v4425_v3 }
 0x2f2   :  { %2862 = vmatmul.mubr.f32.vlgmr.msra.gmra.mrb[2].mxu1 %v4427_v19 }
 0x2f3   :  { %3916 = vmatpush3.bf16.msra.mxu1 %v4392_v32  ;;  %3111 = vmatprep.mubr.msk.f32.mxu1 %vm4430_vm8, %v4431_v59 }
 0x2f4   :  { %3917 = vmatprep.subr.bf16.mxu1 %v4429_v20 }
 0x2f7   :  { %3919 = vmatpush3.bf16.msra.mxu1 %v4393_v14 }
 0x2f8   :  { %3920 = vmatprep.subr.bf16.mxu1 %v4429_v20 }
 0x2fb   :  { %3922 = vmatpush3.bf16.msra.mxu1 %v4394_v9 }
 0x2fc   :  { %3923 = vmatprep.subr.bf16.mxu1 %v4429_v20 }
 0x2ff   :  { %3925 = vmatpush3.bf16.msra.mxu1 %v4395_v15 }
 0x300   :  { %3926 = vmatprep.subr.bf16.mxu1 %v4429_v20 }
 0x303   :  { %3928 = vmatpush3.bf16.msra.mxu1 %v4396_v57 }
 0x304   :  { %3929 = vmatprep.subr.bf16.mxu1 %v4429_v20 }
 0x307   :  { %3931 = vmatpush3.bf16.msra.mxu1 %v4397_v37 }
 0x308   :  { %3932 = vmatprep.subr.bf16.mxu1 %v4429_v20 }
 0x30b   :  { %3934 = vmatpush3.bf16.msra.mxu1 %v4398_v43 }
 0x30c   :  { %3935 = vmatprep.subr.bf16.mxu1 %v4429_v20 }
 0x30f   :  { %3937 = vmatpush3.bf16.msra.mxu1 %v4399_v51 }
 0x3c5   :  { %v2863_v33 = vpop.f32.mrb[2].mxu1 }
 0x3c6   :  { %v2865_v11 = vpop.f32.mrb[3].mxu1  ;;  %v3944_v1 = vadd.f32 %v2863_v33, %v2648_v60 }
 0x3c7   :  { %v3945_v56 = vadd.f32 %v2865_v11, %v2652_v63 }
 0x3c9   :  { %2938 = vmatprep.mubr.f32.mxu0 %v3945_v56 }
 0x3ca   :  { %2939 = vmatmul.mubr.f32.vlgmr.msra.gmra.mrb[4].mxu0 %v3944_v1 }
 0x49d   :  { %v3059_v47 = vpop.f32.mrb[4].mxu0 }
 0x49e   :  { %v3060_v29 = vpop.f32.mrb[5].mxu0 }
 0x49f   :  { %v3061_v13 = vadd.f32 %v3060_v29, %v3059_v47 }
 0x4a1   :  { %v2941_v17 = vadd.f32 %v3061_v13, %v3025_v21 }
 0x4a3   :  { %3112 = vmatmul.mubr.f32.vlgmr.msra.gmra.mrb[4].mxu1 %v2941_v17 }
 0x576   :  { %v3016_v35 = vpop.f32.mrb[4].mxu1 }
 0x577   :  { %v3017_v38 = vadd.f32 %v3026_v40, %v3016_v35  ;;  %v3113_v7 = vpop.f32.mrb[5].mxu1 }
 0x579   :  { %3020 = vst [vmem:[%s6546_s5] sm:$0xff] %v3017_v38 }

</bundles_post_ra>
